<compile_context>
chip_gen: v7x
topology: tpu7x:2x2x1
jax: 0.10.0
libtpu: 0.0.40
codegen_flags: <defaults>
</compile_context>

<pallas_src>
import functools

import jax
import jax.numpy as jnp
from jax import lax
from jax.experimental import pallas as pl
from jax.experimental.pallas import tpu as pltpu


# ----------------------------------------------------------------------------
# Kernels
# ----------------------------------------------------------------------------

def _softmax_head(x, avg_order):
    """x: (Bt, C, S) f32 -> g: (Bt, C) probabilities (matches the PyTorch head)."""
    if avg_order == 1:                       # adaptive-avg-pool then softmax over C
        pooled = jnp.mean(x, axis=2)                               # (Bt, C)
        m = jnp.max(pooled, axis=1, keepdims=True)
        e = jnp.exp(pooled - m)
        return e / jnp.sum(e, axis=1, keepdims=True)
    # softmax over C per spatial position, then pool
    m = jnp.max(x, axis=1, keepdims=True)                          # (Bt, 1, S)
    e = jnp.exp(x - m)
    sm = e / jnp.sum(e, axis=1, keepdims=True)                     # (Bt, C, S)
    return jnp.mean(sm, axis=2)                                    # (Bt, C)


def _g_kernel(x_ref, g_ref, *, avg_order):
    g_ref[...] = _softmax_head(x_ref[...], avg_order)


def _pred_kernel(x_ref, p_ref, *, avg_order):
    x = x_ref[...]                                                 # (Bt, C, S)
    bt, c, _ = x.shape
    if avg_order == 1:
        # softmax is monotone -> argmax of pooled logits == argmax of softmax.
        scores = jnp.mean(x, axis=2)
    else:
        scores = _softmax_head(x, avg_order)
    idx = lax.broadcasted_iota(jnp.int32, (bt, c), 1).astype(jnp.float32)
    maxv = jnp.max(scores, axis=1, keepdims=True)
    cand = jnp.where(scores == maxv, idx, float(c))                # first-max tiebreak
    p_ref[...] = jnp.min(cand, axis=1, keepdims=True).astype(jnp.int32)


def _loss_kernel(x_ref, y_ref, c_ref, ce_ref, cen_ref, *, avg_order, num_classes):
    """Per-batch-block partial sums of the CE loss and the center loss."""
    x = x_ref[...]                                                 # (Bt, C, S) f32
    y = y_ref[...]                                                 # (Bt, 1)    int32
    bt, c, _ = x.shape

    classes = lax.broadcasted_iota(jnp.int32, (bt, c), 1)
    onehot = (classes == y).astype(jnp.float32)                    # (Bt, C)

    # ---- one-hot cross entropy ----
    if avg_order == 1:
        # log-softmax directly: no exp->log round trip, no -inf on underflow.
        pooled = jnp.mean(x, axis=2)                               # (Bt, C)
        z = pooled - jnp.max(pooled, axis=1, keepdims=True)
        log_g = z - jnp.log(jnp.sum(jnp.exp(z), axis=1, keepdims=True))
    else:
        # softmax over C per spatial position, spatial mean, then log.
        # exp over (Bt,C,S) already saturates the single EUP slot, so an
        # approx-reciprocal would not help; keep the exact divide.
        m = jnp.max(x, axis=1, keepdims=True)
        e = jnp.exp(x - m)
        sm = e / jnp.sum(e, axis=1, keepdims=True)
        log_g = jnp.log(jnp.mean(sm, axis=2))                      # (Bt, C)
    ce_sum = jnp.sum(-jnp.sum(onehot * log_g, axis=1, keepdims=True))

    # ---- center loss: squared distance to the own-class center ----
    # Gather the per-sample center with a static unroll over the (small) class
    # count, directly in the (Bt, C, S) layout: no flattened second copy of x,
    # no in-kernel reshape, no lane-sparse (Bt, num_classes) distance matrix.
    sel = (y == 0).astype(jnp.float32)                             # (Bt, 1)
    c_y = sel[:, :, None] * c_ref[0]                               # (Bt, C, S)
    for k in range(1, num_classes):
        sel = (y == k).astype(jnp.float32)
        c_y = c_y + sel[:, :, None] * c_ref[k]
    d = x - c_y
    dist = jnp.sum(jnp.sum(d * d, axis=2), axis=1, keepdims=True)  # (Bt, 1)
    # The reference CenterLoss clamps the onehot-masked (B, num_classes) matrix
    # element-wise, so each masked-off zero contributes 1e-12; add that exactly.
    cen_sum = (jnp.sum(jnp.clip(dist, 1e-12, 1e12))
               + float(bt * (num_classes - 1)) * 1e-12)

    # Per-block partial sums, broadcast into an (8,128)-aligned tile each so the
    # batch grid axis stays "parallel" (every step writes a distinct block).
    ce_ref[...] = jnp.broadcast_to(ce_sum, ce_ref.shape)
    cen_ref[...] = jnp.broadcast_to(cen_sum, cen_ref.shape)


# ----------------------------------------------------------------------------
# Wrapper
# ----------------------------------------------------------------------------

_PARALLEL = pltpu.CompilerParams(dimension_semantics=("parallel",))


class CSSRCriterion:
    """JAX/Pallas re-implementation of the PyTorch CSSRCriterion forward pass."""

    def __init__(self, avg_order, enable_sigma=True, num_classes=7,
                 feat_dim=5488, block_b=None, key=None):
        self.avg_order = {'avg_softmax': 1, 'softmax_avg': 2}[avg_order]
        self.enable_sigma = enable_sigma
        self.num_classes = num_classes
        self.feat_dim = feat_dim
        self.block_b = block_b            # None -> auto (VMEM-budget derived)
        if key is None:
            key = jax.random.PRNGKey(0)
        # CenterLoss parameter: centers ~ N(0, 1), deterministic init.
        self.centers = jax.random.normal(
            key, (num_classes, feat_dim), dtype=jnp.float32)

    # ---- batch tiling ----
    def _pick_block_b(self, batch, row_bytes):
        if self.block_b is not None:
            cap = self.block_b
        else:
            # Keep the double-buffered x block at ~<=12 MiB so it fits the
            # default scoped-VMEM budget on every generation (incl. v7x with
            # 64 MiB physical / 32 MiB scoped).
            cap = max(8, min(512, ((12 << 20) // (2 * row_bytes)) // 8 * 8))
        if batch <= cap:
            return batch                  # single full block: always layout-legal
        for t in range(cap, 7, -1):       # need a multiple of 8 for 2-D blocks
            if batch % t == 0 and t % 8 == 0:
                return t
        # TODO(synk): pad + mask ragged batches instead of one giant block.
        return batch

    def _grid(self, x3d):
        b, c, s = x3d.shape
        bb = self._pick_block_b(b, c * s * 4)
        return bb, b // bb

    # ---- Pallas calls ----
    def _prob(self, x3d):
        b, c, s = x3d.shape
        bb, nb = self._grid(x3d)
        kernel = functools.partial(_g_kernel, avg_order=self.avg_order)
        return pl.pallas_call(
            kernel,
            out_shape=jax.ShapeDtypeStruct((b, c), jnp.float32),
            grid=(nb,),
            in_specs=[pl.BlockSpec((bb, c, s), lambda i: (i, 0, 0))],
            out_specs=pl.BlockSpec((bb, c), lambda i: (i, 0)),
            compiler_params=_PARALLEL,
        )(x3d)

    def _pred(self, x3d):
        b, c, s = x3d.shape
        bb, nb = self._grid(x3d)
        kernel = functools.partial(_pred_kernel, avg_order=self.avg_order)
        out = pl.pallas_call(
            kernel,
            out_shape=jax.ShapeDtypeStruct((b, 1), jnp.int32),
            grid=(nb,),
            in_specs=[pl.BlockSpec((bb, c, s), lambda i: (i, 0, 0))],
            out_specs=pl.BlockSpec((bb, 1), lambda i: (i, 0)),
            compiler_params=_PARALLEL,
        )(x3d)
        return out[:, 0]

    def _loss(self, x3d, y2d, centers3d):
        b, c, s = x3d.shape
        bb, nb = self._grid(x3d)
        ncls = self.num_classes
        kernel = functools.partial(_loss_kernel, avg_order=self.avg_order,
                                   num_classes=ncls)
        ce_parts, cen_parts = pl.pallas_call(
            kernel,
            out_shape=(jax.ShapeDtypeStruct((nb, 8, 128), jnp.float32),
                       jax.ShapeDtypeStruct((nb, 8, 128), jnp.float32)),
            grid=(nb,),
            in_specs=[
                # x: single copy of the activations, batch-blocked.
                pl.BlockSpec((bb, c, s), lambda i: (i, 0, 0)),
                # labels: tiny (bb,1) int32 block (~1% of the x DMA).
                pl.BlockSpec((bb, 1), lambda i: (i, 0)),
                # centers: same block index every step -> fetched once, resident.
                pl.BlockSpec((ncls, c, s), lambda i: (0, 0, 0)),
            ],
            out_specs=(pl.BlockSpec((1, 8, 128), lambda i: (i, 0, 0)),
                       pl.BlockSpec((1, 8, 128), lambda i: (i, 0, 0))),
            compiler_params=_PARALLEL,
        )(x3d, y2d, centers3d)
        # Tiny scalar glue: combine per-block partial sums.
        ce_loss = jnp.sum(ce_parts[:, 0, 0]) / b
        cen_loss = jnp.sum(cen_parts[:, 0, 0]) / b
        return ce_loss + 0.3 * jnp.log(cen_loss)

    def __call__(self, x, y=None, prob=False, pred=False):
        # x: (B, C, H, W) f32 (NCHW, same as PyTorch)
        b, c, h, w = x.shape
        x3d = x.astype(jnp.float32).reshape(b, c, h * w)     # layout glue only
        if prob:
            return self._prob(x3d)
        if pred:
            return self._pred(x3d)
        assert y is not None
        assert c == self.num_classes and c * h * w == self.feat_dim
        y2d = jnp.reshape(y, (b, 1)).astype(jnp.int32)
        centers3d = self.centers.reshape(self.num_classes, c, h * w)  # tiny, once
        return self._loss(x3d, y2d, centers3d)


# ----------------------------------------------------------------------------
# Pure-JAX reference (for a light correctness check) and demo
# ----------------------------------------------------------------------------

def _ref_forward(x, y, centers, avg_order):
    b, c, _, _ = x.shape
    if avg_order == 1:
        g = jax.nn.softmax(jnp.mean(x, axis=(2, 3)), axis=1)
    else:
        g = jnp.mean(jax.nn.softmax(x, axis=1), axis=(2, 3))
    onehot = jax.nn.one_hot(y, c, dtype=jnp.float32)
    ce = jnp.mean(-jnp.sum(onehot * jnp.log(g), axis=1))
    feats = x.reshape(b, -1)
    xsq = jnp.sum(feats * feats, axis=1, keepdims=True)
    csq = jnp.sum(centers * centers, axis=1)[None, :]
    distmat = xsq + csq - 2.0 * feats @ centers.T
    cen = jnp.sum(jnp.clip(distmat * onehot, 1e-12, 1e12)) / b
    return ce + 0.3 * jnp.log(cen), g, jnp.argmax(g, axis=1)


if __name__ == "__main__":
    # Small shapes consistent with the module: num_classes = 7 channels,
    # 8x8 spatial => feat_dim = 7 * 64 = 448 (original uses 7 * 28*28 = 5488).
    B, C, H, W = 16, 7, 8, 8

    key = jax.random.PRNGKey(0)
    kx, ky, kc = jax.random.split(key, 3)
    x = jax.random.normal(kx, (B, C, H, W), dtype=jnp.float32)
    y = jax.random.randint(ky, (B,), 0, C, dtype=jnp.int32)

    results = []
    for order in ("avg_softmax", "softmax_avg"):
        # block_b=8 -> 2-step batch grid, exercising the pipelined partial sums.
        crit = CSSRCriterion(order, enable_sigma=True, num_classes=C,
                             feat_dim=C * H * W, block_b=8, key=kc)
        loss = crit(x, y)
        g = crit(x, prob=True)
        preds = crit(x, pred=True)
        jax.block_until_ready((loss, g, preds))

        ref_loss, ref_g, ref_pred = _ref_forward(x, y, crit.centers, crit.avg_order)
        assert jnp.allclose(loss, ref_loss, rtol=1e-3, atol=1e-4), (loss, ref_loss)
        assert jnp.allclose(g, ref_g, rtol=1e-3, atol=1e-5)
        assert jnp.array_equal(preds, ref_pred)
        results.append(loss)

    jax.block_until_ready(results)
    print("KERNEL_OK")
</pallas_src>

<mosaic_0001>
module attributes {stable_mosaic.version = 11 : i64} {
  func.func @_loss_kernel(%arg0: i32, %arg1: memref<8x7x64xf32, #tpu.memory_space<vmem>>, %arg2: memref<8x1xi32, #tpu.memory_space<vmem>>, %arg3: memref<7x7x64xf32, #tpu.memory_space<vmem>>, %arg4: memref<1x8x128xf32, #tpu.memory_space<vmem>>, %arg5: memref<1x8x128xf32, #tpu.memory_space<vmem>>) attributes {dimension_semantics = [#tpu.dimension_semantics<parallel>], iteration_bounds = array<i64: 2>, scalar_prefetch = 0 : i64, scratch_operands = 0 : i64, tpu.core_type = #tpu.core_type<tc>, window_params = [{transform_indices = @transform_0, window_bounds = array<i64: 8, 7, 64>}, {transform_indices = @transform_1, window_bounds = array<i64: 8, 1>}, {pipeline_mode = #tpu.pipeline_mode<synchronous>, transform_indices = @transform_2, window_bounds = array<i64: 7, 7, 64>}, {transform_indices = @transform_3, window_bounds = array<i64: 1, 8, 128>}, {transform_indices = @transform_4, window_bounds = array<i64: 1, 8, 128>}]} {
    %c0 = arith.constant 0 : index
    %c0_0 = arith.constant 0 : index
    %c0_1 = arith.constant 0 : index
    %0 = vector.load %arg1[%c0, %c0_0, %c0_1] : memref<8x7x64xf32, #tpu.memory_space<vmem>>, vector<8x7x64xf32>
    %c0_2 = arith.constant 0 : index
    %c0_3 = arith.constant 0 : index
    %1 = vector.load %arg2[%c0_2, %c0_3] : memref<8x1xi32, #tpu.memory_space<vmem>>, vector<8x1xi32>
    %2 = tpu.iota {dimensions = array<i32: 1>} : vector<8x7xi32>
    %3 = vector.broadcast %1 : vector<8x1xi32> to vector<8x7xi32>
    %4 = arith.cmpi eq, %2, %3 : vector<8x7xi32>
    %5 = arith.extui %4 : vector<8x7xi1> to vector<8x7xi32>
    %6 = arith.sitofp %5 : vector<8x7xi32> to vector<8x7xf32>
    %cst = arith.constant dense<0.000000e+00> : vector<8x7xf32>
    %7 = vector.multi_reduction <add>, %0, %cst [2] : vector<8x7x64xf32> to vector<8x7xf32>
    %cst_4 = arith.constant 6.400000e+01 : f32
    %8 = vector.broadcast %cst_4 : f32 to vector<8x7xf32>
    %9 = arith.divf %7, %8 : vector<8x7xf32>
    %cst_5 = arith.constant dense<0xFF800000> : vector<8xf32>
    %10 = vector.multi_reduction <maximumf>, %9, %cst_5 [1] : vector<8x7xf32> to vector<8xf32>
    %11 = vector.shape_cast %10 : vector<8xf32> to vector<8x1xf32>
    %12 = vector.broadcast %11 : vector<8x1xf32> to vector<8x7xf32>
    %13 = arith.subf %9, %12 : vector<8x7xf32>
    %14 = math.exp %13 : vector<8x7xf32>
    %cst_6 = arith.constant dense<0.000000e+00> : vector<8xf32>
    %15 = vector.multi_reduction <add>, %14, %cst_6 [1] : vector<8x7xf32> to vector<8xf32>
    %16 = vector.shape_cast %15 : vector<8xf32> to vector<8x1xf32>
    %17 = math.log %16 : vector<8x1xf32>
    %18 = vector.broadcast %17 : vector<8x1xf32> to vector<8x7xf32>
    %19 = arith.subf %13, %18 : vector<8x7xf32>
    %20 = arith.mulf %6, %19 : vector<8x7xf32>
    %cst_7 = arith.constant dense<0.000000e+00> : vector<8xf32>
    %21 = vector.multi_reduction <add>, %20, %cst_7 [1] : vector<8x7xf32> to vector<8xf32>
    %22 = vector.shape_cast %21 : vector<8xf32> to vector<8x1xf32>
    %cst_8 = arith.constant 0.000000e+00 : f32
    %23 = vector.broadcast %cst_8 : f32 to vector<8x1xf32>
    %24 = arith.subf %23, %22 : vector<8x1xf32>
    %25 = vector.shape_cast %24 : vector<8x1xf32> to vector<1x8x1xf32>
    %cst_9 = arith.constant dense<0.000000e+00> : vector<1xf32>
    %26 = vector.multi_reduction <add>, %25, %cst_9 [1, 2] : vector<1x8x1xf32> to vector<1xf32>
    %27 = vector.shape_cast %26 : vector<1xf32> to vector<1x1x1xf32>
    %28 = vector.extract %27[0, 0, 0] : f32 from vector<1x1x1xf32>
    %c0_i32 = arith.constant 0 : i32
    %29 = vector.broadcast %c0_i32 : i32 to vector<8x1xi32>
    %30 = arith.cmpi eq, %1, %29 : vector<8x1xi32>
    %31 = arith.extui %30 : vector<8x1xi1> to vector<8x1xi32>
    %32 = arith.sitofp %31 : vector<8x1xi32> to vector<8x1xf32>
    %33 = vector.shape_cast %32 : vector<8x1xf32> to vector<8x1x1xf32>
    %c0_10 = arith.constant 0 : index
    %c0_11 = arith.constant 0 : index
    %c0_12 = arith.constant 0 : index
    %34 = vector.load %arg3[%c0_10, %c0_11, %c0_12] : memref<7x7x64xf32, #tpu.memory_space<vmem>>, vector<1x7x64xf32>
    %35 = vector.shape_cast %34 : vector<1x7x64xf32> to vector<7x64xf32>
    %36 = vector.shape_cast %35 : vector<7x64xf32> to vector<1x7x64xf32>
    %37 = vector.broadcast %33 : vector<8x1x1xf32> to vector<8x7x64xf32>
    %38 = vector.broadcast %36 : vector<1x7x64xf32> to vector<8x7x64xf32>
    %39 = arith.mulf %37, %38 : vector<8x7x64xf32>
    %c1_i32 = arith.constant 1 : i32
    %40 = vector.broadcast %c1_i32 : i32 to vector<8x1xi32>
    %41 = arith.cmpi eq, %1, %40 : vector<8x1xi32>
    %42 = arith.extui %41 : vector<8x1xi1> to vector<8x1xi32>
    %43 = arith.sitofp %42 : vector<8x1xi32> to vector<8x1xf32>
    %44 = vector.shape_cast %43 : vector<8x1xf32> to vector<8x1x1xf32>
    %c1 = arith.constant 1 : index
    %c0_13 = arith.constant 0 : index
    %c0_14 = arith.constant 0 : index
    %45 = vector.load %arg3[%c1, %c0_13, %c0_14] : memref<7x7x64xf32, #tpu.memory_space<vmem>>, vector<1x7x64xf32>
    %46 = vector.shape_cast %45 : vector<1x7x64xf32> to vector<7x64xf32>
    %47 = vector.shape_cast %46 : vector<7x64xf32> to vector<1x7x64xf32>
    %48 = vector.broadcast %44 : vector<8x1x1xf32> to vector<8x7x64xf32>
    %49 = vector.broadcast %47 : vector<1x7x64xf32> to vector<8x7x64xf32>
    %50 = arith.mulf %48, %49 : vector<8x7x64xf32>
    %51 = arith.addf %39, %50 : vector<8x7x64xf32>
    %c2_i32 = arith.constant 2 : i32
    %52 = vector.broadcast %c2_i32 : i32 to vector<8x1xi32>
    %53 = arith.cmpi eq, %1, %52 : vector<8x1xi32>
    %54 = arith.extui %53 : vector<8x1xi1> to vector<8x1xi32>
    %55 = arith.sitofp %54 : vector<8x1xi32> to vector<8x1xf32>
    %56 = vector.shape_cast %55 : vector<8x1xf32> to vector<8x1x1xf32>
    %c2 = arith.constant 2 : index
    %c0_15 = arith.constant 0 : index
    %c0_16 = arith.constant 0 : index
    %57 = vector.load %arg3[%c2, %c0_15, %c0_16] : memref<7x7x64xf32, #tpu.memory_space<vmem>>, vector<1x7x64xf32>
    %58 = vector.shape_cast %57 : vector<1x7x64xf32> to vector<7x64xf32>
    %59 = vector.shape_cast %58 : vector<7x64xf32> to vector<1x7x64xf32>
    %60 = vector.broadcast %56 : vector<8x1x1xf32> to vector<8x7x64xf32>
    %61 = vector.broadcast %59 : vector<1x7x64xf32> to vector<8x7x64xf32>
    %62 = arith.mulf %60, %61 : vector<8x7x64xf32>
    %63 = arith.addf %51, %62 : vector<8x7x64xf32>
    %c3_i32 = arith.constant 3 : i32
    %64 = vector.broadcast %c3_i32 : i32 to vector<8x1xi32>
    %65 = arith.cmpi eq, %1, %64 : vector<8x1xi32>
    %66 = arith.extui %65 : vector<8x1xi1> to vector<8x1xi32>
    %67 = arith.sitofp %66 : vector<8x1xi32> to vector<8x1xf32>
    %68 = vector.shape_cast %67 : vector<8x1xf32> to vector<8x1x1xf32>
    %c3 = arith.constant 3 : index
    %c0_17 = arith.constant 0 : index
    %c0_18 = arith.constant 0 : index
    %69 = vector.load %arg3[%c3, %c0_17, %c0_18] : memref<7x7x64xf32, #tpu.memory_space<vmem>>, vector<1x7x64xf32>
    %70 = vector.shape_cast %69 : vector<1x7x64xf32> to vector<7x64xf32>
    %71 = vector.shape_cast %70 : vector<7x64xf32> to vector<1x7x64xf32>
    %72 = vector.broadcast %68 : vector<8x1x1xf32> to vector<8x7x64xf32>
    %73 = vector.broadcast %71 : vector<1x7x64xf32> to vector<8x7x64xf32>
    %74 = arith.mulf %72, %73 : vector<8x7x64xf32>
    %75 = arith.addf %63, %74 : vector<8x7x64xf32>
    %c4_i32 = arith.constant 4 : i32
    %76 = vector.broadcast %c4_i32 : i32 to vector<8x1xi32>
    %77 = arith.cmpi eq, %1, %76 : vector<8x1xi32>
    %78 = arith.extui %77 : vector<8x1xi1> to vector<8x1xi32>
    %79 = arith.sitofp %78 : vector<8x1xi32> to vector<8x1xf32>
    %80 = vector.shape_cast %79 : vector<8x1xf32> to vector<8x1x1xf32>
    %c4 = arith.constant 4 : index
    %c0_19 = arith.constant 0 : index
    %c0_20 = arith.constant 0 : index
    %81 = vector.load %arg3[%c4, %c0_19, %c0_20] : memref<7x7x64xf32, #tpu.memory_space<vmem>>, vector<1x7x64xf32>
    %82 = vector.shape_cast %81 : vector<1x7x64xf32> to vector<7x64xf32>
    %83 = vector.shape_cast %82 : vector<7x64xf32> to vector<1x7x64xf32>
    %84 = vector.broadcast %80 : vector<8x1x1xf32> to vector<8x7x64xf32>
    %85 = vector.broadcast %83 : vector<1x7x64xf32> to vector<8x7x64xf32>
    %86 = arith.mulf %84, %85 : vector<8x7x64xf32>
    %87 = arith.addf %75, %86 : vector<8x7x64xf32>
    %c5_i32 = arith.constant 5 : i32
    %88 = vector.broadcast %c5_i32 : i32 to vector<8x1xi32>
    %89 = arith.cmpi eq, %1, %88 : vector<8x1xi32>
    %90 = arith.extui %89 : vector<8x1xi1> to vector<8x1xi32>
    %91 = arith.sitofp %90 : vector<8x1xi32> to vector<8x1xf32>
    %92 = vector.shape_cast %91 : vector<8x1xf32> to vector<8x1x1xf32>
    %c5 = arith.constant 5 : index
    %c0_21 = arith.constant 0 : index
    %c0_22 = arith.constant 0 : index
    %93 = vector.load %arg3[%c5, %c0_21, %c0_22] : memref<7x7x64xf32, #tpu.memory_space<vmem>>, vector<1x7x64xf32>
    %94 = vector.shape_cast %93 : vector<1x7x64xf32> to vector<7x64xf32>
    %95 = vector.shape_cast %94 : vector<7x64xf32> to vector<1x7x64xf32>
    %96 = vector.broadcast %92 : vector<8x1x1xf32> to vector<8x7x64xf32>
    %97 = vector.broadcast %95 : vector<1x7x64xf32> to vector<8x7x64xf32>
    %98 = arith.mulf %96, %97 : vector<8x7x64xf32>
    %99 = arith.addf %87, %98 : vector<8x7x64xf32>
    %c6_i32 = arith.constant 6 : i32
    %100 = vector.broadcast %c6_i32 : i32 to vector<8x1xi32>
    %101 = arith.cmpi eq, %1, %100 : vector<8x1xi32>
    %102 = arith.extui %101 : vector<8x1xi1> to vector<8x1xi32>
    %103 = arith.sitofp %102 : vector<8x1xi32> to vector<8x1xf32>
    %104 = vector.shape_cast %103 : vector<8x1xf32> to vector<8x1x1xf32>
    %c6 = arith.constant 6 : index
    %c0_23 = arith.constant 0 : index
    %c0_24 = arith.constant 0 : index
    %105 = vector.load %arg3[%c6, %c0_23, %c0_24] : memref<7x7x64xf32, #tpu.memory_space<vmem>>, vector<1x7x64xf32>
    %106 = vector.shape_cast %105 : vector<1x7x64xf32> to vector<7x64xf32>
    %107 = vector.shape_cast %106 : vector<7x64xf32> to vector<1x7x64xf32>
    %108 = vector.broadcast %104 : vector<8x1x1xf32> to vector<8x7x64xf32>
    %109 = vector.broadcast %107 : vector<1x7x64xf32> to vector<8x7x64xf32>
    %110 = arith.mulf %108, %109 : vector<8x7x64xf32>
    %111 = arith.addf %99, %110 : vector<8x7x64xf32>
    %112 = arith.subf %0, %111 : vector<8x7x64xf32>
    %113 = arith.mulf %112, %112 : vector<8x7x64xf32>
    %cst_25 = arith.constant dense<0.000000e+00> : vector<8x7xf32>
    %114 = vector.multi_reduction <add>, %113, %cst_25 [2] : vector<8x7x64xf32> to vector<8x7xf32>
    %cst_26 = arith.constant dense<0.000000e+00> : vector<8xf32>
    %115 = vector.multi_reduction <add>, %114, %cst_26 [1] : vector<8x7xf32> to vector<8xf32>
    %116 = vector.shape_cast %115 : vector<8xf32> to vector<8x1xf32>
    %cst_27 = arith.constant 9.99999996E-13 : f32
    %cst_28 = arith.constant 9.99999995E+11 : f32
    %117 = vector.broadcast %cst_27 : f32 to vector<8x1xf32>
    %118 = arith.maximumf %117, %116 : vector<8x1xf32>
    %119 = vector.broadcast %cst_28 : f32 to vector<8x1xf32>
    %120 = arith.minimumf %119, %118 : vector<8x1xf32>
    %121 = vector.shape_cast %120 : vector<8x1xf32> to vector<1x8x1xf32>
    %cst_29 = arith.constant dense<0.000000e+00> : vector<1xf32>
    %122 = vector.multi_reduction <add>, %121, %cst_29 [1, 2] : vector<1x8x1xf32> to vector<1xf32>
    %123 = vector.shape_cast %122 : vector<1xf32> to vector<1x1x1xf32>
    %124 = vector.extract %123[0, 0, 0] : f32 from vector<1x1x1xf32>
    %cst_30 = arith.constant 4.800000e-11 : f32
    %125 = arith.addf %124, %cst_30 : f32
    %126 = vector.broadcast %28 : f32 to vector<1x8x128xf32>
    %c0_31 = arith.constant 0 : index
    %c0_32 = arith.constant 0 : index
    %c0_33 = arith.constant 0 : index
    %127 = vector.load %arg4[%c0_31, %c0_32, %c0_33] : memref<1x8x128xf32, #tpu.memory_space<vmem>>, vector<1x8x128xf32>
    tpu.vector_store %arg4[%c0_31, %c0_32, %c0_33], %126 {strides = array<i32>} : memref<1x8x128xf32, #tpu.memory_space<vmem>>, vector<1x8x128xf32>,
    %128 = vector.broadcast %125 : f32 to vector<1x8x128xf32>
    %c0_34 = arith.constant 0 : index
    %c0_35 = arith.constant 0 : index
    %c0_36 = arith.constant 0 : index
    %129 = vector.load %arg5[%c0_34, %c0_35, %c0_36] : memref<1x8x128xf32, #tpu.memory_space<vmem>>, vector<1x8x128xf32>
    tpu.vector_store %arg5[%c0_34, %c0_35, %c0_36], %128 {strides = array<i32>} : memref<1x8x128xf32, #tpu.memory_space<vmem>>, vector<1x8x128xf32>,
    return
  }
  func.func @transform_0(%arg0: i32) -> (i32, i32, i32) {
    %c0_i32 = arith.constant 0 : i32
    %c0_i32_0 = arith.constant 0 : i32
    %c0_i32_1 = arith.constant 0 : i32
    return %arg0, %c0_i32, %c0_i32_0 : i32, i32, i32
  }
  func.func @transform_1(%arg0: i32) -> (i32, i32) {
    %c0_i32 = arith.constant 0 : i32
    %c0_i32_0 = arith.constant 0 : i32
    return %arg0, %c0_i32 : i32, i32
  }
  func.func @transform_2(%arg0: i32) -> (i32, i32, i32) {
    %c0_i32 = arith.constant 0 : i32
    %c0_i32_0 = arith.constant 0 : i32
    %c0_i32_1 = arith.constant 0 : i32
    %c0_i32_2 = arith.constant 0 : i32
    return %c0_i32, %c0_i32_0, %c0_i32_1 : i32, i32, i32
  }
  func.func @transform_3(%arg0: i32) -> (i32, i32, i32) {
    %c0_i32 = arith.constant 0 : i32
    %c0_i32_0 = arith.constant 0 : i32
    %c0_i32_1 = arith.constant 0 : i32
    return %arg0, %c0_i32, %c0_i32_0 : i32, i32, i32
  }
  func.func @transform_4(%arg0: i32) -> (i32, i32, i32) {
    %c0_i32 = arith.constant 0 : i32
    %c0_i32_0 = arith.constant 0 : i32
    %c0_i32_1 = arith.constant 0 : i32
    return %arg0, %c0_i32, %c0_i32_0 : i32, i32, i32
  }
}

</mosaic_0001>

<bundles_post_ra>
// kernel: tpu_custom_call.1
= control target key start
LH: loop header
LB: loop body
LE: loop exit
PB: predicated region body
PF: predicated region fallthrough
CT: control target
= control target key end

     0   :  { %10 = vsyncpa [#allocation3], 0  ;;  %s2821_s0 = inlined_call_operand.vmem [shape: f32[16,7,64], index: 0, kind: input, shape index: {}]   ;;  %s2822_s1 = inlined_call_operand.vmem [shape: s32[16,1], index: 1, kind: input, shape index: {}]   ;;  %s2823_s2 = inlined_call_operand.vmem [shape: f32[7,7,64], index: 2, kind: input, shape index: {}]   ;;  %s2824_s3 = inlined_call_operand.hbm [shape: f32[2,8,128], index: 3, kind: output, shape index: {0}]   ;;  %s2825_s4 = inlined_call_operand.hbm [shape: f32[2,8,128], index: 4, kind: output, shape index: {1}]  }
   0x1   :  { %12 = vsyncpa [#allocation3 + $0x1], 0 }
   0x2   :  { %13 = vsyncpa [#allocation5], 0 }
   0x3   :  { %15 = vsyncpa [#allocation5 + $0x1], 0  ;;  %s2063_s15 = smov 0   ;;  %s2065_s16 = smov 0  }
   0x4   :  { %s2067_s17 = smov 0   ;;  %s2069_s18 = smov 0  }
   0x5 LB: > { %s2084_s19 = sadd.s32 4294967295, %s2031_s18   ;;  %s1794_s20 = sadd.s32 4294967294, %s2031_s18   ;;  %s2031_s18 = sphi %s2069_s18, %s2831_s18   ;;  %s2027_s17 = sphi %s2067_s17, %s2830_s17   ;;  %s2023_s16 = sphi %s2065_s16, %s2829_s16   ;;  %s2019_s15 = sphi %s2063_s15, %s2828_s15  }
   0x6   : > { %s2088_s21 = sadd.s32 1, %s2031_s18   ;;  %s101_s22 = sadd.s32 1, %s2027_s17 }
   0x7   : > { %s98_s23 = ssub.s32 %s2031_s18, %s2088_s21  ;;  %p111_p0 = scmp.ne.s32.totalorder %s2027_s17, %s2023_s16 }
   0x8   : > { %p99_p1 = scmp.eq.s32.totalorder %s98_s23, 0  ;;  %p112_p2 = scmp.eq.s32.totalorder %s2084_s19, 1 }
   0x9   : > { %p117_p3 = scmp.ne.s32.totalorder %s2023_s16, %s2019_s15  ;;  %p118_p4 = scmp.eq.s32.totalorder %s1794_s20, 1 }
   0xa   : > { %s2099_s24 = scalar_select %p99_p1, %s2027_s17, %s101_s22  }
   0xb   : > { %p2101_p5 = por %p112_p2, %p111_p0  ;;  %p2105_p6 = por %p118_p4, %p117_p3 }
   0xc   : > { %p1797_p7 = scmp.ge.s32.totalorder %s2031_s18, 1  ;;  %p181_p8 = scmp.lt.s32.totalorder %s2031_s18, 3 }
   0xe   : > { %p182_p9 = pnand %p1797_p7, %p181_p8 }
   0xf   : > { %s1800_s27 = sshll.u32 (!%p182_p9), %s2084_s19, 3  ;;  %vm243_vm0 = vcmask (!%p182_p9), 522240   ;;  %v2033_v16 = vmov (!%p182_p9), 0   ;;  %p222_p11 = scmp.lt.s32.totalorder (!%p182_p9), %s2084_s19, 1  ;;  %v2034_v17 = vmov (!%p182_p9), 1966171168   ;;  %v235_v19 = vlaneseq (!%p182_p9) }
  0x10   : > { %185 = sbr.rel (%p182_p9) target bundleno = 1244 (0x4dc), region = 32  ;;  %p217_p10 = scmp.lt.s32.totalorder (!%p182_p9), %s1800_s27, 15  ;;  %1880 = vset.pattern.permute.xlu0 (!%p182_p9), %v2033_v16  ;;  %1874 = vset.pattern.permute.xlu1 (!%p182_p9), %v2033_v16  ;;  %v621_v18 = vunpack.c.l.s4 (!%p182_p9), %v2034_v17  ;;  %v2035_v24 = vmov (!%p182_p9), 0.0   ;;  %vm317_vm3 = vcmask (!%p182_p9), 1041409   ;;  %vm319_vm4 = vcmask (!%p182_p9), 1042434  }
  0x11   : > { %v2146_v22 = vshrl.u32 (!%p182_p9), %v235_v19, 7  ;;  %v2173_v35 = vand.u32 (!%p182_p9), 127, %v235_v19  ;;  %vm321_vm5 = vcmask (!%p182_p9), 1043459   ;;  %vm323_vm6 = vcmask (!%p182_p9), 1044484   ;;  %s1819_s12 = sshll.u32 (!%p182_p9), %s2084_s19, 7  ;;  %s2036_s30 = smov (!%p182_p9), [#allocation2]  }
  0x12   : > { %v622_v21 = vunpack.c.0.s8 (!%p182_p9), %v621_v18  ;;  %vm325_vm7 = vcmask (!%p182_p9), 1045509   ;;  %vm327_vm8 = vcmask (!%p182_p9), 1046534   ;;  %vm329_vm9 = vcmask (!%p182_p9), 1047559   ;;  %s2743_s22 = scalar_lea.hbm (!%p182_p9), %s2824_s3, %s1819_s12 }
  0x13   : > { %v2162_v28 = vsub.s32 (!%p182_p9), 0, %v2146_v22  ;;  %v2177_v38 = vsub.s32 (!%p182_p9), %v2173_v35, %v2146_v22  ;;  %vm332_vm10 = vcmask (!%p182_p9), 56320  }
  0x14   : > { %v2150_v23 = vsub.s32 (!%p182_p9), %v622_v21, %v2146_v22 }
  0x17   : > { %s2833_s27 = smov (!%p217_p10, %s1800_s27), 15 }
  0x18   : > { %s1801_s28 = sshll.u32 %s2833_s27, 3 }
  0x19   : > { %s2115_s5 = scalar_lea.vmem %s2821_s0, %s1801_s28 }
  0x1a   : > { %v226_v0 = vld [vmem:[%s2115_s5] sm:$0x7f]  ;;  %v228_v1 = vld [vmem:[%s2115_s5 + $0x10] sm:$0x7f]  ;;  %v2120_v2 = vld [vmem:[%s2115_s5 + $0x8] sm:$0x7f] }
  0x1b   : > { %v244_v3 = vsel %vm243_vm0, %v226_v0, 0.0  ;;  %v250_v4 = vsel %vm243_vm0, %v228_v1, 0.0  ;;  %v229_v5 = vld [vmem:[%s2115_s5 + $0x18] sm:$0x7f]  ;;  %v247_v6 = vsel %vm243_vm0, %v2120_v2, 0.0  ;;  %s223_s6 = scalar_select %p222_p11, %s2084_s19, 1 }
  0x1c   : > { %245 = vadd.xlane.f32.xlu0 %v244_v3  ;;  %251 = vadd.xlane.f32.xlu1 %v250_v4  ;;  %v253_v7 = vsel %vm243_vm0, %v229_v5, 0.0  ;;  %v230_v8 = vld [vmem:[%s2115_s5 + $0x20] sm:$0x7f]  ;;  %v231_v9 = vld [vmem:[%s2115_s5 + $0x28] sm:$0x7f] }
  0x1d   : > { %v256_v10 = vsel %vm243_vm0, %v230_v8, 0.0  ;;  %v259_v11 = vsel %vm243_vm0, %v231_v9, 0.0  ;;  %v232_v12 = vld [vmem:[%s2115_s5 + $0x30] sm:$0x7f]  ;;  %v233_v13 = vld [vmem:[%s2115_s5 + $0x38] sm:$0x7f] }
  0x1e   : > { %v262_v14 = vsel %vm243_vm0, %v232_v12, 0.0  ;;  %v265_v15 = vsel %vm243_vm0, %v233_v13, 0.0  ;;  %s1802_s7 = sshll.u32 %s223_s6, 3  ;;  %s1941_s6 = sshll.u32 %s2036_s30, 4  ;;  %s1942_s6 = int_to_ptr.vmem [resolvable:$false] %s1941_s6 }
  0x1f   : > { %s2141_s10 = scalar_lea.vmem %s2822_s1, %s1802_s7  ;;  %s1943_s7 = scalar_lea.vmem %s1942_s6, 256 }
  0x20   : > { %248 = vadd.xlane.f32.xlu0 %v247_v6  ;;  %254 = vadd.xlane.f32.xlu1 %v253_v7  ;;  %v2144_v20 = vld [vmem:[%s2141_s10] sm:$0xff] }
  0x21   : > { %vm741_vm1 = vcmp.eq.s32.totalorder %v2144_v20, 1  ;;  %vm615_vm2 = vcmp.eq.s32.totalorder %v2144_v20, 0  ;;  %vm876_vm11 = vcmp.eq.s32.totalorder %v2144_v20, 2  ;;  %vm1011_vm12 = vcmp.eq.s32.totalorder %v2144_v20, 3 }
  0x22   : > { %v2153_v25 = vsel %vm741_vm1, 1.0, %v2035_v24  ;;  %v2159_v27 = vsel %vm615_vm2, 1.0, %v2035_v24  ;;  %vm1146_vm13 = vcmp.eq.s32.totalorder %v2144_v20, 4  ;;  %vm1281_vm14 = vcmp.eq.s32.totalorder %v2144_v20, 5 }
  0x23   : > { %v752_v26 = vrot.slane %v2153_v25, %v2150_v23  ;;  %v626_v30 = vrot.slane %v2159_v27, %v2150_v23  ;;  %vm1416_vm15 = vcmp.eq.s32.totalorder %v2144_v20, 6  ;;  %vm604_vm1 = vcmask 7168  }
  0x24   : > { %257 = vadd.xlane.f32.xlu0 %v256_v10  ;;  %260 = vadd.xlane.f32.xlu1 %v259_v11  ;;  %v619_v11 = vcombine.high %v2159_v27, %v2159_v27 }
  0x25   : > { %v2165_v29 = vrot.slane %v752_v26, %v2150_v23  ;;  %v642_v31 = vrot.slane %v626_v30, %v2150_v23  ;;  %v634_v6 = vcombine.high %v626_v30, %v626_v30  ;;  %v760_v7 = vcombine.high %v752_v26, %v752_v26 }
  0x26   : > { %v633_v17 = vrot.slane %v619_v11, %v2150_v23 }
  0x27   : > { %v799_v32 = vrot.slane %v2165_v29, %v2162_v28  ;;  %v672_v33 = vrot.slane %v642_v31, %v2162_v28  ;;  %v656_v8 = vrot.slane %v634_v6, %v2150_v23  ;;  %v782_v9 = vrot.slane %v760_v7, %v2150_v23 }
  0x28   : > { %263 = vadd.xlane.f32.xlu0 %v262_v14  ;;  %266 = vadd.xlane.f32.xlu1 %v265_v15  ;;  %v664_v12 = vcombine.high %v642_v31, %v642_v31  ;;  %v790_v14 = vcombine.high %v2165_v29, %v2165_v29  ;;  %v1807_v15 = vsel %vm876_vm11, 1.0, %v2035_v24  ;;  %v2235_v27 = vrot.slane %v633_v17, %v2150_v23 }
  0x29   : > { %v1875_v34 = vpack.i.bf16 %v799_v32, %v672_v33  ;;  %v676_v10 = vrot.slane %v656_v8, %v2162_v28  ;;  %v803_v13 = vrot.slane %v782_v9, %v2162_v28  ;;  %v666_v19 = vcombine.high %v656_v8, %v656_v8 }
  0x2a   : > { %v680_v16 = vrot.slane %v664_v12, %v2162_v28  ;;  %v807_v18 = vrot.slane %v790_v14, %v2162_v28  ;;  %v887_v21 = vrot.slane %v1807_v15, %v2150_v23  ;;  %v792_v26 = vcombine.high %v782_v9, %v782_v9 }
  0x2b   : > { %v684_v29 = vrot.slane %v666_v19, %v2162_v28  ;;  %v745_v31 = vcombine.high %v2153_v25, %v2153_v25  ;;  %v2242_v32 = vsel %vm1011_vm12, 1.0, %v2035_v24  ;;  %v635_v6 = vcombine.high %v633_v17, %v633_v17 }
  0x2c   : > { %v903_v30 = vrot.slane %v887_v21, %v2150_v23  ;;  %v811_v33 = vrot.slane %v792_v26, %v2162_v28  ;;  %v880_v7 = vcombine.high %v1807_v15, %v1807_v15 }
  0x2d   : > { %v663_v12 = vrot.slane %v635_v6, %v2150_v23 }
  0x2e   : > { %v925_v11 = vcombine.high %v903_v30, %v903_v30 }
  0x30   : > { %v942_v26 = vrot.slane %v925_v11, %v2162_v28  ;;  %v2358_v11 = vld [vmem:[%s2823_s2 + $0x10] sm:$0x7f] }
  0x39   : > { %1876 = vperm.xlu1 %1874, %v1875_v34   ;;  %v688_v34 = vrot.slane %v2235_v27, %v2162_v28 }
  0x3d   : > { %706 = vperm.xlu1 %1874, %v676_v10  }
  0x41   : > { %710 = vperm.xlu1 %1874, %v680_v16   ;;  %v2310_v16 = vsel %vm1146_vm13, 1.0, %v2035_v24 }
  0xa9   : > { %v246_v36 = vpop.xlane.xlu0 %245  ;;  %v252_v37 = vpop.xlane.xlu1 %251 }
  0xaa   : > { %v2179_v39 = vmul.f32 0.015625, %v246_v36  ;;  %v2181_v40 = vmul.f32 0.015625, %v252_v37  ;;  %v934_v36 = vrot.slane %v903_v30, %v2162_v28  ;;  %v895_v37 = vcombine.high %v887_v21, %v887_v21 }
  0xac   : > { %v288_v45 = vrot.slane %v2179_v39, %v2177_v38  ;;  %v296_v48 = vrot.slane %v2181_v40, %v2177_v38  ;;  %v1881_v25 = vpack.i.bf16 %v688_v34, %v934_v36  ;;  %v1157_v34 = vrot.slane %v2310_v16, %v2150_v23 }
  0xad   : > { %v249_v41 = vpop.xlane.xlu0 %248  ;;  %v255_v42 = vpop.xlane.xlu1 %254  ;;  %v1015_v36 = vcombine.high %v2242_v32, %v2242_v32 }
  0xae   : > { %v2183_v43 = vmul.f32 0.015625, %v249_v41  ;;  %v2185_v44 = vmul.f32 0.015625, %v255_v42  ;;  %v2249_v41 = vrot.slane %v745_v31, %v2150_v23  ;;  %v1022_v42 = vrot.slane %v2242_v32, %v2150_v23 }
  0xb0   : > { %v292_v46 = vrot.slane %v2183_v43, %v2177_v38  ;;  %v300_v47 = vrot.slane %v2185_v44, %v2177_v38  ;;  %v1030_v8 = vcombine.high %v1022_v42, %v1022_v42  ;;  %v761_v30 = vcombine.high %v2249_v41, %v2249_v41 }
  0xb1   : > { %v258_v49 = vpop.xlane.xlu0 %257  ;;  %v261_v50 = vpop.xlane.xlu1 %260 }
  0xb2   : > { %v318_v51 = vsel %vm317_vm3, %v292_v46, %v288_v45  ;;  %v2196_v52 = vmul.f32 0.015625, %v258_v49  ;;  %v2198_v53 = vmul.f32 0.015625, %v261_v50  ;;  %v2254_v45 = vrot.slane %v895_v37, %v2150_v23 }
  0xb3   : > { %v320_v54 = vsel %vm319_vm4, %v296_v48, %v318_v51  ;;  %v2258_v46 = vrot.slane %v2249_v41, %v2150_v23  ;;  %v2307_v14 = vrot.slane %v1030_v8, %v2150_v23 }
  0xb4   : > { %v322_v55 = vsel %vm321_vm5, %v300_v47, %v320_v54  ;;  %v304_v56 = vrot.slane %v2196_v52, %v2177_v38  ;;  %v308_v57 = vrot.slane %v2198_v53, %v2177_v38  ;;  %v2261_v47 = vrot.slane %v1022_v42, %v2150_v23 }
  0xb5   : > { %v264_v58 = vpop.xlane.xlu0 %263  ;;  %v267_v59 = vpop.xlane.xlu1 %266  ;;  %v938_v48 = vrot.slane %v2254_v45, %v2162_v28  ;;  %v815_v49 = vrot.slane %v2258_v46, %v2162_v28  ;;  %v343_v54 = vsub.s32 1, %v2146_v22  ;;  %v2326_v42 = vsel %vm1281_vm14, 1.0, %v2035_v24 }
  0xb6   : > { %v324_v60 = vsel %vm323_vm6, %v304_v56, %v322_v55  ;;  %v2207_v61 = vmul.f32 0.015625, %v264_v58  ;;  %v2209_v62 = vmul.f32 0.015625, %v267_v59  ;;  %v1069_v50 = vrot.slane %v2261_v47, %v2162_v28 }
  0xb7   : > { %v326_v1 = vsel %vm325_vm7, %v308_v57, %v324_v60  ;;  %v927_v8 = vcombine.high %v2254_v45, %v2254_v45  ;;  %v351_v45 = vsub.s32 3, %v2146_v22 }
  0xb8   : > { %v312_v63 = vrot.slane %v2207_v61, %v2177_v38  ;;  %v316_v0 = vrot.slane %v2209_v62, %v2177_v38  ;;  %v1886_v51 = vpack.i.bf16 %v1069_v50, %v815_v49  ;;  %v692_v50 = vrot.slane %v663_v12, %v2162_v28 }
  0xb9   : > { %v1877_v56 = vpop.permute.xlu1 %1876 }
  0xba   : > { %v328_v3 = vsel %vm327_vm8, %v312_v63, %v326_v1  ;;  %v2286_v63 = vld [vmem:[%s2823_s2] sm:$0x7f]  ;;  %v1878_v19 = vunpack.i.l.bf16 %v1877_v56 }
  0xbb   : > { %v330_v4 = vsel %vm329_vm9, %v316_v0, %v328_v3  ;;  %v2293_v3 = vld [vmem:[%s2823_s2 + $0x8] sm:$0x7f] }
  0xbc   : > { %v333_v5 = vsel %vm332_vm10, %v330_v4, -inf }
  0xbd   : > { %334 = vmax.xlane.f32.xlu0 %v333_v5  ;;  %v707_v4 = vpop.permute.xlu1 %706 }
  0xd3   : > { %833 = vperm.xlu0 %1880, %v803_v13   ;;  %v2304_v13 = vrot.slane %v880_v7, %v2150_v23 }
  0xd5   : > { %v896_v31 = vcombine.high %v2304_v13, %v2304_v13 }
  0xd7   : > { %837 = vperm.xlu0 %1880, %v807_v18   ;;  %v1879_v18 = vunpack.i.h.bf16 %v1877_v56  ;;  %v2334_v56 = vrot.slane %v761_v30, %v2150_v23  ;;  %v924_v32 = vrot.slane %v896_v31, %v2150_v23  ;;  %v946_v30 = vrot.slane %v927_v8, %v2162_v28 }
  0xd8   : > { %v665_v31 = vcombine.high %v2235_v27, %v2235_v27 }
  0xd9   : > { %v860_v41 = vmul.f32 %v1879_v18, %v2293_v3  ;;  %v819_v6 = vrot.slane %v2334_v56, %v2162_v28  ;;  %v954_v7 = vrot.slane %v924_v32, %v2162_v28 }
  0xdb   : > { %714 = vperm.xlu0 %1880, %v684_v29   ;;  %v667_v29 = vcombine.high %v663_v12, %v663_v12 }
  0xdf   : > { %841 = vperm.xlu0 %1880, %v811_v33   ;;  %v1073_v33 = vrot.slane %v2307_v14, %v2162_v28 }
  0xe3   : > { %1882 = vperm.xlu0 %1880, %v1881_v25  }
  0xe7   : > { %968 = vperm.xlu0 %1880, %v938_v48   ;;  %v733_v48 = vmul.f32 %v1878_v19, %v2286_v63 }
  0xeb   : > { %1887 = vperm.xlu0 %1880, %v1886_v51   ;;  %v700_v51 = vrot.slane %v667_v29, %v2162_v28 }
 0x14a   : > { %v2270_v55 = vpop.xlane.xlu0 %334 }
 0x14b   : > { %v340_v57 = vrot.slane %v2270_v55, %v2162_v28  ;;  %v344_v58 = vrot.slane %v2270_v55, %v343_v54 }
 0x14d   : > { %v2278_v59 = vsub.f32 %v2179_v39, %v340_v57  ;;  %v2281_v60 = vsub.f32 %v2183_v43, %v344_v58  ;;  %v734_v39 = vmul.f32 %v707_v4, %v2286_v63  ;;  %v1165_v57 = vcombine.high %v1157_v34, %v1157_v34 }
 0x14e   : > { %v2338_v58 = vrot.slane %v1015_v36, %v2150_v23  ;;  %v347_v4 = vsub.s32 2, %v2146_v22 }
 0x14f   : > { %v385_v0 = vmul.f32 1.442695, %v2278_v59  ;;  %v387_v1 = vmul.f32 1.442695, %v2281_v60  ;;  %v1187_v12 = vrot.slane %v1165_v57, %v2150_v23 }
 0x150   : > { %v348_v19 = vrot.slane %v2270_v55, %v347_v4 }
 0x151   : > { %1911 = vpow2.f32 %v387_v1 }
 0x152   : > { %1913 = vpow2.f32 %v385_v0  ;;  %v834_v43 = vpop.permute.xlu0 %833  ;;  %v2342_v0 = vrot.slane %v2326_v42, %v2150_v23  ;;  %v2393_v27 = vsub.f32 %v2181_v40, %v348_v19 }
 0x153   : > { %v861_v5 = vmul.f32 %v2293_v3, %v834_v43  ;;  %v868_v43 = vadd.f32 %v860_v41, %v733_v48  ;;  %v355_v41 = vsub.s32 4, %v2146_v22  ;;  %v352_v48 = vrot.slane %v2270_v55, %v351_v45 }
 0x155   : > { %v2297_v9 = vadd.f32 %v861_v5, %v734_v39  ;;  %v356_v40 = vrot.slane %v2270_v55, %v355_v41 }
 0x156   : > { %v2299_v10 = vpop.permute.xlu0 %837 }
 0x157   : > { %v2421_v19 = vsub.f32 %v2196_v52, %v356_v40 }
 0x15a   : > { %v715_v15 = vpop.permute.xlu0 %714 }
 0x15b   : > { %v1912_v17 = vpop.eup %1911  ;;  %v736_v37 = vmul.f32 %v715_v15, %v2286_v63  ;;  %v2363_v15 = vrot.slane %v2338_v58, %v2150_v23 }
 0x15c   : > { %v1914_v21 = vpop.eup %1913  ;;  %413 = vperm.xlu0 %1880, %v1912_v17   ;;  %v2367_v17 = vrot.slane %v2342_v0, %v2150_v23 }
 0x15d   : > { %410 = vperm.xlu1 %1874, %v1914_v21   ;;  %v1085_v36 = vrot.slane %v2363_v15, %v2162_v28 }
 0x15e   : > { %v842_v25 = vpop.permute.xlu0 %841 }
 0x15f   : > { %v863_v49 = vmul.f32 %v2293_v3, %v842_v25 }
 0x160   : > { %972 = vperm.xlu0 %1880, %v942_v26  }
 0x161   : > { %1103 = vperm.xlu1 %1874, %v1073_v33   ;;  %v2344_v1 = vadd.f32 %v863_v49, %v736_v37  ;;  %v1208_v33 = vrot.slane %v1187_v12, %v2162_v28  ;;  %v1339_v37 = vrot.slane %v2367_v17, %v2162_v28  ;;  %v696_v49 = vrot.slane %v665_v31, %v2162_v28 }
 0x162   : > { %v2347_v39 = vpop.permute.xlu0 %1882  ;;  %v367_v31 = vsub.s32 7, %v2146_v22 }
 0x163   : > { %v1884_v5 = vunpack.i.l.bf16 %v2347_v39  ;;  %v1896_v57 = vpack.i.bf16 %v1339_v37, %v1085_v36  ;;  %v393_v36 = vmul.f32 1.442695, %v2421_v19 }
 0x164   : > { %722 = vperm.xlu0 %1880, %v692_v50   ;;  %v791_v50 = vcombine.high %v2258_v46, %v2258_v46  ;;  %v389_v46 = vmul.f32 1.442695, %v2393_v27 }
 0x165   : > { %730 = vperm.xlu1 %1874, %v700_v51   ;;  %v995_v18 = vmul.f32 %v1884_v5, %v2358_v11  ;;  %v910_v51 = vrot.slane %v2304_v13, %v2150_v23  ;;  %v359_v5 = vsub.s32 5, %v2146_v22 }
 0x166   : > { %v969_v21 = vpop.permute.xlu0 %968  ;;  %v823_v13 = vrot.slane %v791_v50, %v2162_v28  ;;  %1915 = vpow2.f32 %v389_v46 }
 0x167   : > { %v2374_v26 = vadd.f32 %v995_v18, %v868_v43  ;;  %v996_v29 = vmul.f32 %v2358_v11, %v969_v21  ;;  %v928_v43 = vcombine.high %v924_v32, %v924_v32  ;;  %v363_v32 = vsub.s32 6, %v2146_v22 }
 0x168   : > { %849 = vperm.xlu0 %1880, %v819_v6   ;;  %v2408_v6 = vsub.f32 %v2185_v44, %v352_v48  ;;  %v1197_v18 = vcombine.high %v1187_v12, %v1187_v12  ;;  %v360_v44 = vrot.slane %v2270_v55, %v359_v5  ;;  %v368_v48 = vrot.slane %v2270_v55, %v367_v31 }
 0x169   : > { %984 = vperm.xlu1 %1874, %v954_v7   ;;  %v2386_v25 = vadd.f32 %v996_v29, %v2297_v9  ;;  %v2401_v9 = vrot.slane %v1157_v34, %v2150_v23  ;;  %v950_v34 = vrot.slane %v910_v51, %v2162_v28  ;;  %v962_v8 = vrot.slane %v928_v43, %v2162_v28 }
 0x16a   : > { %v391_v21 = vmul.f32 1.442695, %v2408_v6  ;;  %v1216_v12 = vrot.slane %v1197_v18, %v2162_v28  ;;  %v2432_v52 = vsub.f32 %v2198_v53, %v360_v44  ;;  %v1062_v43 = vcombine.high %v2307_v14, %v2307_v14 }
 0x16b   : > { %v1204_v7 = vrot.slane %v2401_v9, %v2162_v28  ;;  %v926_v46 = vcombine.high %v910_v51, %v910_v51  ;;  %v1195_v14 = vcombine.high %v2401_v9, %v2401_v9  ;;  %v1815_v51 = vsel %vm1416_vm15, 1.0, %v2035_v24 }
 0x16c   : > { %976 = vperm.xlu0 %1880, %v946_v30   ;;  %v1060_v30 = vcombine.high %v2261_v47, %v2261_v47  ;;  %1917 = vpow2.f32 %v391_v21  ;;  %v793_v47 = vcombine.high %v2334_v56, %v2334_v56  ;;  %v395_v53 = vmul.f32 1.442695, %v2432_v52 }
 0x16d   : > { %1238 = vperm.xlu1 %1874, %v1208_v33   ;;  %v1891_v29 = vpack.i.bf16 %v1204_v7, %v950_v34  ;;  %v364_v33 = vrot.slane %v2270_v55, %v363_v32  ;;  %1919 = vpow2.f32 %v393_v36  ;;  %v2449_v56 = vsub.f32 %v2209_v62, %v368_v48 }
 0x16e   : > { %v1077_v37 = vrot.slane %v1060_v30, %v2162_v28  ;;  %1921 = vpow2.f32 %v395_v53  ;;  %v958_v62 = vrot.slane %v926_v46, %v2162_v28  ;;  %v1031_v7 = vcombine.high %v2338_v58, %v2338_v58 }
 0x16f   : > { %v1212_v18 = vrot.slane %v1195_v14, %v2162_v28  ;;  %v1300_v44 = vcombine.high %v2342_v0, %v2342_v0  ;;  %v1427_v58 = vrot.slane %v1815_v51, %v2150_v23  ;;  %v1061_v36 = vcombine.high %v2363_v15, %v2363_v15 }
 0x170   : > { %726 = vperm.xlu0 %1880, %v696_v49   ;;  %v2442_v49 = vsub.f32 %v2207_v61, %v364_v33  ;;  %v1916_v50 = vpop.eup %1915  ;;  %v1081_v61 = vrot.slane %v1062_v43, %v2162_v28  ;;  %v1059_v9 = vrot.slane %v1031_v7, %v2150_v23  ;;  %v1330_v53 = vcombine.high %v2367_v17, %v2367_v17 }
 0x171   : > { %1897 = vperm.xlu1 %1874, %v1896_v57   ;;  %v827_v57 = vrot.slane %v793_v47, %v2162_v28  ;;  %v1322_v30 = vrot.slane %v1300_v44, %v2150_v23  ;;  %v1443_v33 = vrot.slane %v1427_v58, %v2150_v23  ;;  %v1285_v43 = vcombine.high %v2326_v42, %v2326_v42 }
 0x172   : > { %v397_v40 = vmul.f32 1.442695, %v2442_v49 }
 0x173   : > { %v1474_v48 = vrot.slane %v1443_v33, %v2162_v28  ;;  %v1299_v14 = vrot.slane %v1285_v43, %v2150_v23 }
 0x174   : > { %853 = vperm.xlu0 %1880, %v823_v13   ;;  %v399_v13 = vmul.f32 1.442695, %v2449_v56  ;;  %1923 = vpow2.f32 %v397_v40  ;;  %v1420_v40 = vcombine.high %v1815_v51, %v1815_v51 }
 0x175   : > { %992 = vperm.xlu1 %1874, %v962_v8   ;;  %v1150_v8 = vcombine.high %v2310_v16, %v2310_v16  ;;  %v1089_v16 = vrot.slane %v1059_v9, %v2162_v28 }
 0x176   : > { %v1918_v55 = vpop.eup %1917  ;;  %1925 = vpow2.f32 %v399_v13  ;;  %v1435_v13 = vcombine.high %v1427_v58, %v1427_v58  ;;  %v1434_v17 = vrot.slane %v1420_v40, %v2150_v23 }
 0x177   : > { %v1920_v34 = vpop.eup %1919  ;;  %v1164_v21 = vrot.slane %v1150_v8, %v2150_v23  ;;  %v1315_v8 = vrot.slane %v1299_v14, %v2150_v23 }
 0x178   : > { %1892 = vperm.xlu0 %1880, %v1891_v29   ;;  %v1922_v20 = vpop.eup %1921  ;;  %v1457_v7 = vrot.slane %v1435_v13, %v2150_v23  ;;  %v2492_v51 = vrot.slane %v1434_v17, %v2150_v23  ;;  %v2510_v13 = vpop.permute.xlu0 %1887 }
 0x179   : > { %1246 = vperm.xlu1 %1874, %v1216_v12   ;;  %v1180_v12 = vrot.slane %v1164_v21, %v2150_v23  ;;  %v1355_v44 = vrot.slane %v1315_v8, %v2162_v28 }
 0x17b   : > { %v1220_v47 = vrot.slane %v1180_v12, %v2162_v28 }
 0x17c   : > { %1107 = vperm.xlu0 %1880, %v1077_v37   ;;  %v1343_v37 = vrot.slane %v1322_v30, %v2162_v28 }
 0x17d   : > { %416 = vperm.xlu1 %1874, %v1916_v50   ;;  %v1093_v50 = vrot.slane %v1061_v36, %v2162_v28  ;;  %v1901_v15 = vpack.i.bf16 %v1474_v48, %v1220_v47  ;;  %v1467_v47 = vcombine.high %v1457_v7, %v1457_v7 }
 0x17e   : > { %v1924_v29 = vpop.eup %1923 }
 0x180   : > { %857 = vperm.xlu0 %1880, %v827_v57   ;;  %v1926_v0 = vpop.eup %1925  ;;  %v1166_v57 = vcombine.high %v1164_v21, %v1164_v21  ;;  %v1490_v21 = vrot.slane %v2492_v51, %v2162_v28 }
 0x181   : > { %419 = vperm.xlu1 %1874, %v1918_v55   ;;  %v1347_v55 = vrot.slane %v1330_v53, %v2162_v28  ;;  %v1331_v53 = vcombine.high %v1315_v8, %v1315_v8 }
 0x182   : > { %v1194_v46 = vrot.slane %v1166_v57, %v2150_v23 }
 0x183   : > { %v1363_v43 = vrot.slane %v1331_v53, %v2162_v28 }
 0x184   : > { %1111 = vperm.xlu0 %1880, %v1081_v61   ;;  %v1063_v61 = vcombine.high %v1059_v9, %v1059_v9  ;;  %v1224_v42 = vrot.slane %v1194_v46, %v2162_v28  ;;  %v1478_v9 = vrot.slane %v1457_v7, %v2162_v28  ;;  %v1198_v36 = vcombine.high %v1194_v46, %v1194_v46 }
 0x185   : > { %422 = vperm.xlu1 %1874, %v1920_v34  }
 0x186   : > { %v1097_v34 = vrot.slane %v1063_v61, %v2162_v28 }
 0x188   : > { %988 = vperm.xlu0 %1880, %v958_v62   ;;  %v1332_v62 = vcombine.high %v1322_v30, %v1322_v30  ;;  %v1906_v30 = vpack.i.bf16 %v1490_v21, %v1355_v44 }
 0x189   : > { %425 = vperm.xlu1 %1874, %v1922_v20   ;;  %v1196_v20 = vcombine.high %v1180_v12, %v1180_v12 }
 0x18b   : > { %v1228_v58 = vrot.slane %v1196_v20, %v2162_v28 }
 0x18c   : > { %1242 = vperm.xlu0 %1880, %v1212_v18   ;;  %v1351_v18 = vrot.slane %v1332_v62, %v2162_v28 }
 0x18d   : > { %428 = vperm.xlu1 %1874, %v1924_v29   ;;  %v1465_v29 = vcombine.high %v1443_v33, %v1443_v33  ;;  %v1486_v33 = vrot.slane %v1467_v47, %v2162_v28 }
 0x190   : > { %1119 = vperm.xlu0 %1880, %v1089_v16   ;;  %v1301_v16 = vcombine.high %v1299_v14, %v1299_v14  ;;  %v711_v14 = vpop.permute.xlu1 %710 }
 0x191   : > { %431 = vperm.xlu1 %1874, %v1926_v0   ;;  %v1482_v0 = vrot.slane %v1465_v29, %v2162_v28 }
 0x192   : > { %v1329_v12 = vrot.slane %v1301_v16, %v2150_v23 }
 0x194   : > { %1373 = vperm.xlu0 %1880, %v1343_v37   ;;  %v1232_v37 = vrot.slane %v1198_v36, %v2162_v28  ;;  %v1359_v48 = vrot.slane %v1329_v12, %v2162_v28  ;;  %v1333_v57 = vcombine.high %v1329_v12, %v1329_v12 }
 0x195   : > { %1123 = vperm.xlu1 %1874, %v1093_v50   ;;  %v1436_v50 = vcombine.high %v1434_v17, %v1434_v17 }
 0x197   : > { %v1464_v40 = vrot.slane %v1436_v50, %v2150_v23  ;;  %v862_v23 = vmul.f32 %v2293_v3, %v2299_v10  ;;  %v1890_v50 = vunpack.i.h.bf16 %v2510_v13 }
 0x198   : > { %1902 = vperm.xlu0 %1880, %v1901_v15   ;;  %v1367_v15 = vrot.slane %v1333_v57, %v2162_v28 }
 0x199   : > { %1377 = vperm.xlu1 %1874, %v1347_v55   ;;  %v1494_v55 = vrot.slane %v1464_v40, %v2162_v28  ;;  %v1468_v61 = vcombine.high %v1464_v40, %v1464_v40 }
 0x19b   : > { %v1502_v46 = vrot.slane %v1468_v61, %v2162_v28 }
 0x19c   : > { %1127 = vperm.xlu0 %1880, %v1097_v34   ;;  %v735_v34 = vmul.f32 %v711_v14, %v2286_v63 }
 0x19d   : > { %1254 = vperm.xlu1 %1874, %v1224_v42  }
 0x19e   : > { %v870_v7 = vadd.f32 %v862_v23, %v735_v34  ;;  %v2551_v34 = vld [vmem:[%s2823_s2 + $0x20] sm:$0x7f] }
 0x1a0   : > { %1381 = vperm.xlu0 %1880, %v1351_v18  }
 0x1a1   : > { %1508 = vperm.xlu1 %1874, %v1478_v9  }
 0x1a4   : > { %1258 = vperm.xlu0 %1880, %v1228_v58  }
 0x1a5   : > { %1907 = vperm.xlu1 %1874, %v1906_v30  }
 0x1a8   : > { %1512 = vperm.xlu0 %1880, %v1482_v0  }
 0x1a9   : > { %1262 = vperm.xlu1 %1874, %v1232_v37  }
 0x1ac   : > { %1389 = vperm.xlu0 %1880, %v1359_v48  }
 0x1ad   : > { %1516 = vperm.xlu1 %1874, %v1486_v33   ;;  %v2539_v33 = vld [vmem:[%s2823_s2 + $0x18] sm:$0x7f] }
 0x1b0   : > { %1393 = vperm.xlu0 %1880, %v1363_v43  }
 0x1b1   : > { %1397 = vperm.xlu1 %1874, %v1367_v15  }
 0x1b4   : > { %1524 = vperm.xlu0 %1880, %v1494_v55   ;;  %v1130_v55 = vmul.f32 %v1890_v50, %v2539_v33 }
 0x1b8   : > { %1532 = vperm.xlu0 %1880, %v1502_v46  }
 0x1db   : > { %v2512_v17 = vpop.permute.xlu0 %413 }
 0x1dc   : > { %v2517_v62 = vpop.permute.xlu1 %410 }
 0x1df   : > { %v973_v42 = vpop.permute.xlu0 %972 }
 0x1e0   : > { %v2519_v8 = vpop.permute.xlu1 %1103  ;;  %v997_v18 = vmul.f32 %v2358_v11, %v973_v42  ;;  %v2556_v42 = vld [vmem:[%s2823_s2 + $0x28] sm:$0x7f] }
 0x1e2   : > { %v2522_v20 = vadd.f32 %v997_v18, %v870_v7  ;;  %v1138_v7 = vadd.f32 %v1130_v55, %v2374_v26 }
 0x1e3   : > { %v723_v9 = vpop.permute.xlu0 %722 }
 0x1e4   : > { %v731_v44 = vpop.permute.xlu1 %730  ;;  %v738_v21 = vmul.f32 %v723_v9, %v2286_v63 }
 0x1e7   : > { %v850_v58 = vpop.permute.xlu0 %849 }
 0x1e8   : > { %v985_v29 = vpop.permute.xlu1 %984  ;;  %v865_v10 = vmul.f32 %v2293_v3, %v850_v58 }
 0x1e9   : > { %v1000_v16 = vmul.f32 %v2358_v11, %v985_v29 }
 0x1ea   : > { %v873_v30 = vadd.f32 %v865_v10, %v738_v21 }
 0x1eb   : > { %v977_v36 = vpop.permute.xlu0 %976 }
 0x1ec   : > { %v2527_v0 = vpop.permute.xlu1 %1238  ;;  %v998_v12 = vmul.f32 %v2358_v11, %v977_v36  ;;  %v2530_v37 = vadd.f32 %v1000_v16, %v873_v30  ;;  %v740_v30 = vmul.f32 %v731_v44, %v2286_v63 }
 0x1ee   : > { %v1006_v47 = vadd.f32 %v998_v12, %v2344_v1 }
 0x1ef   : > { %v727_v48 = vpop.permute.xlu0 %726 }
 0x1f0   : > { %v2533_v53 = vpop.permute.xlu1 %1897  ;;  %v739_v43 = vmul.f32 %v727_v48, %v2286_v63 }
 0x1f1   : > { %v1900_v46 = vunpack.i.h.bf16 %v2533_v53 }
 0x1f3   : > { %v854_v57 = vpop.permute.xlu0 %853  ;;  %v1400_v21 = vmul.f32 %v1900_v46, %v2556_v42 }
 0x1f4   : > { %v993_v40 = vpop.permute.xlu1 %992  ;;  %v866_v15 = vmul.f32 %v2293_v3, %v854_v57 }
 0x1f5   : > { %v1002_v48 = vmul.f32 %v2358_v11, %v993_v40  ;;  %v440_v40 = vrot.slane %v2512_v17, %v2177_v38 }
 0x1f6   : > { %v874_v61 = vadd.f32 %v866_v15, %v739_v43 }
 0x1f7   : > { %v2544_v1 = vpop.permute.xlu0 %1892 }
 0x1f8   : > { %v1247_v14 = vpop.permute.xlu1 %1246  ;;  %v1895_v23 = vunpack.i.h.bf16 %v2544_v1 }
 0x1f9   : > { %v1268_v55 = vmul.f32 %v2551_v34, %v1247_v14 }
 0x1fa   : > { %v1265_v18 = vmul.f32 %v1895_v23, %v2551_v34 }
 0x1fb   : > { %v2560_v9 = vpop.permute.xlu0 %1107 }
 0x1fc   : > { %v1273_v58 = vadd.f32 %v1265_v18, %v1138_v7  ;;  %v417_v29 = vpop.permute.xlu1 %416 }
 0x1fe   : > { %v2563_v10 = vadd.f32 %v1400_v21, %v1273_v58  ;;  %v436_v21 = vrot.slane %v2517_v62, %v2177_v38  ;;  %v444_v58 = vrot.slane %v417_v29, %v2177_v38 }
 0x1ff   : > { %v858_v16 = vpop.permute.xlu0 %857 }
 0x200   : > { %v420_v36 = vpop.permute.xlu1 %419  ;;  %v867_v12 = vmul.f32 %v2293_v3, %v858_v16 }
 0x202   : > { %v875_v50 = vadd.f32 %v867_v12, %v740_v30  ;;  %v448_v30 = vrot.slane %v420_v36, %v2177_v38 }
 0x203   : > { %v1112_v26 = vpop.permute.xlu0 %1111 }
 0x204   : > { %v423_v57 = vpop.permute.xlu1 %422  ;;  %v1133_v43 = vmul.f32 %v2539_v33, %v1112_v26  ;;  %v2569_v15 = vadd.f32 %v1002_v48, %v875_v50  ;;  %v465_v48 = vsel %vm317_vm3, %v440_v40, %v436_v21  ;;  %v1885_v40 = vunpack.i.h.bf16 %v2347_v39 }
 0x205   : > { %v466_v26 = vsel %vm319_vm4, %v444_v58, %v465_v48  ;;  %v1889_v58 = vunpack.i.l.bf16 %v2510_v13  ;;  %v1131_v48 = vmul.f32 %v2539_v33, %v2519_v8  ;;  %v1466_v8 = vcombine.high %v2492_v51, %v2492_v51 }
 0x206   : > { %v1141_v46 = vadd.f32 %v1133_v43, %v1006_v47  ;;  %v452_v47 = vrot.slane %v423_v57, %v2177_v38  ;;  %v467_v43 = vsel %vm321_vm5, %v448_v30, %v466_v26  ;;  %v737_v26 = vmul.f32 %v1885_v40, %v2286_v63 }
 0x207   : > { %v989_v23 = vpop.permute.xlu0 %988  ;;  %v1139_v13 = vadd.f32 %v1131_v48, %v2386_v25  ;;  %v2623_v25 = vld [vmem:[%s2823_s2 + $0x30] sm:$0x7f] }
 0x208   : > { %v426_v7 = vpop.permute.xlu1 %425  ;;  %v1001_v18 = vmul.f32 %v2358_v11, %v989_v23  ;;  %v2573_v44 = vadd.f32 %v1268_v55, %v1141_v46 }
 0x209   : > { %v456_v50 = vrot.slane %v426_v7, %v2177_v38 }
 0x20a   : > { %v1009_v16 = vadd.f32 %v1001_v18, %v874_v61  ;;  %v468_v61 = vsel %vm323_vm6, %v452_v47, %v467_v43  ;;  %v1266_v43 = vmul.f32 %v2551_v34, %v2527_v0 }
 0x20b   : > { %v1243_v12 = vpop.permute.xlu0 %1242  ;;  %v469_v36 = vsel %vm325_vm7, %v456_v50, %v468_v61  ;;  %v1894_v50 = vunpack.i.l.bf16 %v2544_v1 }
 0x20c   : > { %v429_v14 = vpop.permute.xlu1 %428  ;;  %v1274_v63 = vadd.f32 %v1266_v43, %v1139_v13 }
 0x20d   : > { %v460_v62 = vrot.slane %v429_v14, %v2177_v38 }
 0x20f   : > { %v2587_v17 = vpop.permute.xlu0 %1119  ;;  %v470_v55 = vsel %vm327_vm8, %v460_v62, %v469_v36  ;;  %v864_v62 = vmul.f32 %v1889_v58, %v2293_v3  ;;  %v1899_v3 = vunpack.i.l.bf16 %v2533_v53  ;;  %v1498_v53 = vrot.slane %v1466_v8, %v2162_v28 }
 0x210   : > { %v432_v29 = vpop.permute.xlu1 %431 }
 0x211   : > { %v464_v57 = vrot.slane %v432_v29, %v2177_v38  ;;  %v872_v1 = vadd.f32 %v864_v62, %v737_v26 }
 0x213   : > { %v1374_v46 = vpop.permute.xlu0 %1373  ;;  %v471_v23 = vsel %vm329_vm9, %v464_v57, %v470_v55  ;;  %v1132_v57 = vmul.f32 %v2539_v33, %v2560_v9 }
 0x214   : > { %v1124_v7 = vpop.permute.xlu1 %1123  ;;  %v473_v18 = vsel %vm332_vm10, %v471_v23, 0.0  ;;  %v1401_v29 = vmul.f32 %v2556_v42, %v1374_v46  ;;  %v1267_v23 = vmul.f32 %v2551_v34, %v1243_v12 }
 0x215   : > { %v1136_v21 = vmul.f32 %v2539_v33, %v1124_v7  ;;  %474 = vadd.xlane.f32.xlu1 %v473_v18  ;;  %v1134_v7 = vmul.f32 %v1899_v3, %v2539_v33  ;;  %v1140_v40 = vadd.f32 %v1132_v57, %v2522_v20 }
 0x216   : > { %v1409_v46 = vadd.f32 %v1401_v29, %v1274_v63 }
 0x217   : > { %v1144_v30 = vadd.f32 %v1136_v21, %v1009_v16  ;;  %v2598_v47 = vpop.permute.xlu0 %1902  ;;  %v999_v16 = vmul.f32 %v1894_v50, %v2358_v11  ;;  %v1275_v13 = vadd.f32 %v1267_v23, %v1140_v40 }
 0x218   : > { %v1378_v14 = vpop.permute.xlu1 %1377  ;;  %v1904_v36 = vunpack.i.l.bf16 %v2598_v47 }
 0x219   : > { %v1007_v55 = vadd.f32 %v999_v16, %v872_v1  ;;  %v1402_v58 = vmul.f32 %v2556_v42, %v1378_v14 }
 0x21a   : > { %v1269_v18 = vmul.f32 %v1904_v36, %v2551_v34 }
 0x21b   : > { %v2607_v61 = vpop.permute.xlu0 %1127  ;;  %v1142_v26 = vadd.f32 %v1134_v7, %v1007_v55  ;;  %v1410_v63 = vadd.f32 %v1402_v58, %v1275_v13  ;;  %v1905_v58 = vunpack.i.h.bf16 %v2598_v47 }
 0x21c   : > { %v2609_v39 = vpop.permute.xlu1 %1254 }
 0x21d   : > { %v1277_v29 = vadd.f32 %v1269_v18, %v1142_v26  ;;  %v1535_v26 = vmul.f32 %v1905_v58, %v2623_v25 }
 0x21f   : > { %v1382_v0 = vpop.permute.xlu0 %1381 }
 0x220   : > { %v1509_v11 = vpop.permute.xlu1 %1508 }
 0x221   : > { %v1536_v51 = vmul.f32 %v2623_v25, %v1509_v11 }
 0x223   : > { %v1544_v21 = vadd.f32 %v1536_v51, %v1409_v46  ;;  %v1259_v9 = vpop.permute.xlu0 %1258  ;;  %v1930_v51 = vld [vmem:[%s2115_s5 + $0x20] sm:$0x7f] }
 0x224   : > { %v1908_v48 = vpop.permute.xlu1 %1907  ;;  %v1271_v50 = vmul.f32 %v2551_v34, %v1259_v9 }
 0x225   : > { %v1910_v62 = vunpack.i.h.bf16 %v1908_v48  ;;  %v1909_v43 = vunpack.i.l.bf16 %v1908_v48  ;;  %v1552_v12 = vsub.f32 %v2120_v2, %v1544_v21 }
 0x226   : > { %v1279_v16 = vadd.f32 %v1271_v50, %v1144_v30  ;;  %1528 = vperm.xlu1 %1874, %v1498_v53   ;;  %v1929_v30 = vld [vmem:[%s2115_s5 + $0x10] sm:$0x7f] }
 0x227   : > { %v1404_v8 = vmul.f32 %v1909_v43, %v2556_v42  ;;  %v1513_v1 = vpop.permute.xlu0 %1512  ;;  %v1560_v20 = vmul.f32 %v1552_v12, %v1552_v12  ;;  %v1539_v3 = vmul.f32 %v1910_v62, %v2623_v25  ;;  %v1135_v43 = vmul.f32 %v2539_v33, %v2587_v17 }
 0x228   : > { %v1537_v14 = vmul.f32 %v2623_v25, %v1513_v1  ;;  %v1263_v48 = vpop.permute.xlu1 %1262  ;;  %v1403_v12 = vmul.f32 %v2556_v42, %v1382_v0  ;;  %v1137_v1 = vmul.f32 %v2539_v33, %v2607_v61  ;;  %v1931_v0 = vld [vmem:[%s2115_s5] sm:$0x7f] }
 0x229   : > { %v1412_v36 = vadd.f32 %v1404_v8, %v1277_v29  ;;  %v1570_v57 = vsel %vm243_vm0, %v1560_v20, 0.0  ;;  %v1543_v29 = vadd.f32 %v1535_v26, %v2563_v10  ;;  %v1143_v8 = vadd.f32 %v1135_v43, %v2530_v37 }
 0x22a   : > { %v1545_v11 = vadd.f32 %v1537_v14, %v1410_v63  ;;  %1571 = vadd.xlane.f32.xlu0 %v1570_v57  ;;  %v1411_v20 = vadd.f32 %v1403_v12, %v2573_v44  ;;  %v1272_v10 = vmul.f32 %v2551_v34, %v1263_v48  ;;  %v1145_v37 = vadd.f32 %v1137_v1, %v2569_v15 }
 0x22b   : > { %v1390_v2 = vpop.permute.xlu0 %1389  ;;  %v1547_v55 = vadd.f32 %v1539_v3, %v1412_v36  ;;  %v1551_v14 = vsub.f32 %v1931_v0, %v1543_v29 }
 0x22c   : > { %v1553_v46 = vsub.f32 %v1929_v30, %v1545_v11  ;;  %v1517_v62 = vpop.permute.xlu1 %1516  ;;  %v1405_v63 = vmul.f32 %v2556_v42, %v1390_v2  ;;  %v1280_v61 = vadd.f32 %v1272_v10, %v1145_v37  ;;  %v1932_v30 = vld [vmem:[%s2115_s5 + $0x18] sm:$0x7f] }
 0x22d   : > { %v1555_v23 = vsub.f32 %v1930_v51, %v1547_v55  ;;  %v1538_v47 = vmul.f32 %v2623_v25, %v1517_v62  ;;  %v1559_v44 = vmul.f32 %v1551_v14, %v1551_v14 }
 0x22e   : > { %v1561_v53 = vmul.f32 %v1553_v46, %v1553_v46 }
 0x22f   : > { %v1394_v7 = vpop.permute.xlu0 %1393  ;;  %v1563_v9 = vmul.f32 %v1555_v23, %v1555_v23  ;;  %v1546_v36 = vadd.f32 %v1538_v47, %v1411_v20  ;;  %v1567_v23 = vsel %vm243_vm0, %v1559_v44, 0.0 }
 0x230   : > { %v1406_v18 = vmul.f32 %v2556_v42, %v1394_v7  ;;  %v1573_v21 = vsel %vm243_vm0, %v1561_v53, 0.0  ;;  %v1398_v17 = vpop.permute.xlu1 %1397  ;;  %v1933_v7 = vld [vmem:[%s2115_s5 + $0x28] sm:$0x7f] }
 0x231   : > { %1574 = vadd.xlane.f32.xlu0 %v1573_v21  ;;  %v1579_v50 = vsel %vm243_vm0, %v1563_v9, 0.0  ;;  %v1407_v33 = vmul.f32 %v2556_v42, %v1398_v17  ;;  %v1554_v46 = vsub.f32 %v1932_v30, %v1546_v36  ;;  %v1934_v21 = vld [vmem:[%s2115_s5 + $0x38] sm:$0x7f] }
 0x232   : > { %v1414_v40 = vadd.f32 %v1406_v18, %v1279_v16  ;;  %v1270_v16 = vmul.f32 %v2551_v34, %v2609_v39 }
 0x233   : > { %v1525_v13 = vpop.permute.xlu0 %1524  ;;  %v1415_v51 = vadd.f32 %v1407_v33, %v1280_v61  ;;  %v1562_v53 = vmul.f32 %v1554_v46, %v1554_v46 }
 0x234   : > { %v1278_v3 = vadd.f32 %v1270_v16, %v1143_v8  ;;  %v1540_v39 = vmul.f32 %v2623_v25, %v1525_v13  ;;  %v1935_v13 = vld [vmem:[%s2115_s5 + $0x30] sm:$0x7f]  ;;  %s2732_s5 = sand.u32 1, %s2023_s16  }
 0x235   : > { %1580 = vadd.xlane.f32.xlu0 %v1579_v50  ;;  %v1576_v15 = vsel %vm243_vm0, %v1562_v53, 0.0  ;;  %s1798_s9 = sshll.u32 %s2732_s5, 3  ;;  %s1660_s28 = scalar_lea.sflag [#allocation3], %s2732_s5 }
 0x236   : > { %v1413_v11 = vadd.f32 %v1405_v63, %v1278_v3  ;;  %v1936_v3 = vld [vmem:[%s2141_s10] sm:$0xff]  ;;  %s208_s10 = scalar_lea.vmem [#allocation2], %s1798_s9  ;;  %s2745_s23 = scalar_lea.vmem [#allocation4], %s1798_s9 }
 0x237   : > { %v1533_v57 = vpop.permute.xlu0 %1532  ;;  %s1678_s11 = sshll.u32 %s208_s10, 4  ;;  %s1691_s27 = sshll.u32 %s2745_s23, 4  ;;  %s2736_s11 = int_to_ptr.vmem [resolvable:$true] %s1678_s11  ;;  %s2779_s27 = int_to_ptr.vmem [resolvable:$true] %s1691_s27 }
 0x238   : > { %v1548_v2 = vadd.f32 %v1540_v39, %v1413_v11  ;;  %v1542_v55 = vmul.f32 %v2623_v25, %v1533_v57  ;;  %s1937_s29 = scalar_lea.vmem %s2736_s11, 128  ;;  %p1944_p1 = scmp.lt.s32.totalorder %s2736_s11, %s1942_s6 }
 0x239   : > { %p1938_p12 = scmp.ne.s32.totalorder %s2736_s11, %s1937_s29  ;;  %p1945_p2 = scmp.lt.s32.totalorder %s1943_s7, %s1937_s29 }
 0x23a   : > { %v1550_v34 = vadd.f32 %v1542_v55, %v1415_v51  ;;  %v1556_v18 = vsub.f32 %v1933_v7, %v1548_v2 }
 0x23b   : > { %p1939_p13 = pnand %p1938_p12, %p2101_p5  ;;  %p1946_p3 = por %p1945_p2, %p1944_p1 }
 0x23c   : > { %v1564_v42 = vmul.f32 %v1556_v18, %v1556_v18  ;;  %v1558_v9 = vsub.f32 %v1934_v21, %v1550_v34 }
 0x23d   : > { %p1940_p0 = pneg %p1939_p13 }
 0x23e   : > { %v1582_v58 = vsel %vm243_vm0, %v1564_v42, 0.0  ;;  %v1566_v48 = vmul.f32 %v1558_v9, %v1558_v9 }
 0x23f   : > { %p1947_p4 = pnand %p1946_p3, %p1940_p0 }
 0x240   : > { %v1588_v50 = vsel %vm243_vm0, %v1566_v48, 0.0 }
 0x24a   : > { %1568 = vadd.xlane.f32.xlu1 %v1567_v23 }
 0x24e   : > { %1577 = vadd.xlane.f32.xlu1 %v1576_v15 }
 0x252   : > { %1583 = vadd.xlane.f32.xlu1 %v1582_v58 }
 0x256   : > { %1589 = vadd.xlane.f32.xlu1 %v1588_v50 }
 0x2a2   : > { %v475_v26 = vpop.xlane.xlu1 %474 }
 0x2a3   : > { %1927 = vlog2.f32 %v475_v26 }
 0x2a6   : > { %v1529_v62 = vpop.permute.xlu1 %1528 }
 0x2a7   : > { %v1541_v43 = vmul.f32 %v2623_v25, %v1529_v62 }
 0x2a9   : > { %v1549_v12 = vadd.f32 %v1541_v43, %v1414_v40 }
 0x2ab   : > { %v1557_v29 = vsub.f32 %v1935_v13, %v1549_v12 }
 0x2ad   : > { %v1928_v16 = vpop.eup %1927  ;;  %v1565_v47 = vmul.f32 %v1557_v29, %v1557_v29 }
 0x2ae   : > { %v477_v8 = vmul.f32 0.6931472, %v1928_v16 }
 0x2af   : > { %v1585_v1 = vsel %vm243_vm0, %v1565_v47, 0.0 }
 0x2b0   : > { %1586 = vadd.xlane.f32.xlu0 %v1585_v1  ;;  %v486_v20 = vrot.slane %v477_v8, %v343_v54  ;;  %v490_v17 = vrot.slane %v477_v8, %v347_v4  ;;  %v498_v40 = vrot.slane %v477_v8, %v355_v41  ;;  %v506_v14 = vrot.slane %v477_v8, %v363_v32 }
 0x2b2   : > { %v520_v63 = vsub.f32 %v2281_v60, %v486_v20  ;;  %v521_v25 = vsub.f32 %v2393_v27, %v490_v17  ;;  %v523_v0 = vsub.f32 %v2421_v19, %v498_v40  ;;  %v525_v54 = vsub.f32 %v2442_v49, %v506_v14 }
 0x2b3   : > { %v482_v60 = vrot.slane %v477_v8, %v2162_v28  ;;  %v494_v27 = vrot.slane %v477_v8, %v351_v45  ;;  %v502_v19 = vrot.slane %v477_v8, %v359_v5  ;;  %v510_v49 = vrot.slane %v477_v8, %v367_v31 }
 0x2b4   : > { %539 = vperm.xlu1 %1874, %v520_v63  }
 0x2b5   : > { %v519_v4 = vsub.f32 %v2278_v59, %v482_v60  ;;  %v522_v41 = vsub.f32 %v2408_v6, %v494_v27  ;;  %v524_v32 = vsub.f32 %v2432_v52, %v502_v19  ;;  %v526_v28 = vsub.f32 %v2449_v56, %v510_v49 }
 0x2b7   : > { %v1572_v45 = vpop.xlane.xlu0 %1571 }
 0x2b8   : > { %542 = vperm.xlu1 %1874, %v521_v25   ;;  %v1606_v5 = vrot.slane %v1572_v45, %v2177_v38 }
 0x2bc   : > { %548 = vperm.xlu1 %1874, %v523_v0  }
 0x2be   : > { %v1575_v57 = vpop.xlane.xlu0 %1574 }
 0x2bf   : > { %v1610_v31 = vrot.slane %v1575_v57, %v2177_v38 }
 0x2c0   : > { %554 = vperm.xlu1 %1874, %v525_v54  }
 0x2c2   : > { %v1581_v11 = vpop.xlane.xlu0 %1580 }
 0x2c3   : > { %v1618_v61 = vrot.slane %v1581_v11, %v2177_v38 }
 0x2c4   : > { %238 = vperm.xlu1 %1874, %v1936_v3  }
 0x2c6   : > { %536 = vperm.xlu0 %1880, %v519_v4  }
 0x2ca   : > { %545 = vperm.xlu0 %1880, %v522_v41  }
 0x2ce   : > { %551 = vperm.xlu0 %1880, %v524_v32  }
 0x2d2   : > { %557 = vperm.xlu0 %1880, %v526_v28  }
 0x2d7   : > { %v1569_v59 = vpop.xlane.xlu1 %1568 }
 0x2d8   : > { %v1602_v6 = vrot.slane %v1569_v59, %v2177_v38 }
 0x2da   : > { %v1631_v52 = vsel %vm317_vm3, %v1606_v5, %v1602_v6 }
 0x2db   : > { %v1578_v10 = vpop.xlane.xlu1 %1577  ;;  %v1632_v56 = vsel %vm319_vm4, %v1610_v31, %v1631_v52 }
 0x2dc   : > { %v1614_v22 = vrot.slane %v1578_v10, %v2177_v38 }
 0x2de   : > { %v1633_v33 = vsel %vm321_vm5, %v1614_v22, %v1632_v56 }
 0x2df   : > { %v1584_v36 = vpop.xlane.xlu1 %1583  ;;  %v1634_v30 = vsel %vm323_vm6, %v1618_v61, %v1633_v33 }
 0x2e0   : > { %v1622_v44 = vrot.slane %v1584_v36, %v2177_v38 }
 0x2e2   : > { %v1635_v51 = vsel %vm325_vm7, %v1622_v44, %v1634_v30 }
 0x2e3   : > { %v1590_v39 = vpop.xlane.xlu1 %1589 }
 0x2e4   : > { %v1630_v34 = vrot.slane %v1590_v39, %v2177_v38 }
 0x333   : > { %v540_v37 = vpop.permute.xlu1 %539 }
 0x334   : > { %v566_v42 = vrot.slane %v540_v37, %v2177_v38 }
 0x337   : > { %v543_v2 = vpop.permute.xlu1 %542 }
 0x338   : > { %v570_v48 = vrot.slane %v543_v2, %v2177_v38 }
 0x33b   : > { %v549_v7 = vpop.permute.xlu1 %548 }
 0x33c   : > { %v578_v12 = vrot.slane %v549_v7, %v2177_v38 }
 0x33d   : > { %v1587_v55 = vpop.xlane.xlu0 %1586 }
 0x33e   : > { %v1626_v46 = vrot.slane %v1587_v55, %v2177_v38 }
 0x33f   : > { %v555_v9 = vpop.permute.xlu1 %554 }
 0x340   : > { %v1636_v23 = vsel %vm327_vm8, %v1626_v46, %v1635_v51  ;;  %v586_v1 = vrot.slane %v555_v9, %v2177_v38 }
 0x341   : > { %v1637_v53 = vsel %vm329_vm9, %v1630_v34, %v1636_v23 }
 0x342   : > { %v1639_v18 = vsel %vm332_vm10, %v1637_v53, 0.0 }
 0x343   : > { %1640 = vadd.xlane.f32.xlu0 %v1639_v18  ;;  %v239_v29 = vpop.permute.xlu1 %238 }
 0x344   : > { %vm240_vm0 = vcmp.eq.s32.totalorder %v2173_v35, %v239_v29 }
 0x345   : > { %v537_v15 = vpop.permute.xlu0 %536  ;;  %v1803_v25 = vsel %vm240_vm0, 1.0, %v2035_v24 }
 0x346   : > { %v562_v21 = vrot.slane %v537_v15, %v2177_v38 }
 0x348   : > { %v591_v58 = vsel %vm317_vm3, %v566_v42, %v562_v21 }
 0x349   : > { %v546_v50 = vpop.permute.xlu0 %545  ;;  %v592_v62 = vsel %vm319_vm4, %v570_v48, %v591_v58 }
 0x34a   : > { %v574_v26 = vrot.slane %v546_v50, %v2177_v38 }
 0x34c   : > { %v593_v43 = vsel %vm321_vm5, %v574_v26, %v592_v62 }
 0x34d   : > { %v552_v13 = vpop.permute.xlu0 %551  ;;  %v594_v47 = vsel %vm323_vm6, %v578_v12, %v593_v43 }
 0x34e   : > { %v582_v16 = vrot.slane %v552_v13, %v2177_v38 }
 0x350   : > { %v595_v8 = vsel %vm325_vm7, %v582_v16, %v594_v47 }
 0x351   : > { %v558_v20 = vpop.permute.xlu0 %557  ;;  %v596_v17 = vsel %vm327_vm8, %v586_v1, %v595_v8 }
 0x352   : > { %v590_v63 = vrot.slane %v558_v20, %v2177_v38 }
 0x354   : > { %v597_v40 = vsel %vm329_vm9, %v590_v63, %v596_v17 }
 0x355   : > { %v599_v0 = vmul.f32 %v1803_v25, %v597_v40 }
 0x357   : > { %v600_v14 = vsel %vm332_vm10, %v599_v0, 0.0 }
 0x358   : > { %601 = vadd.xlane.f32.xlu1 %v600_v14 }
 0x3d0   : > { %v1641_v54 = vpop.xlane.xlu0 %1640 }
 0x3d1   : > { %v1642_v60 = vmax.f32 %v1641_v54, 1e-12 }
 0x3d3   : > { %v1643_v27 = vmin.f32 %v1642_v60, 1e+12 }
 0x3d5   : > { %v1644_v41 = vsel %vm604_vm1, %v1643_v27, 0.0 }
 0x3e5   : > { %v602_v3 = vpop.xlane.xlu1 %601 }
 0x3e6   : > { %v603_v4 = vsub.f32 0.0, %v602_v3 }
 0x3e8   : > { %v605_v35 = vsel %vm604_vm1, %v603_v4, 0.0 }
 0x3e9   : > { %606 = vadd.xlane.f32.xlu0 %v605_v35 }
 0x3ed   : > { %1645 = vadd.xlane.f32.xlu0 %v1644_v41 }
 0x476   : > { %v607_v38 = vpop.xlane.xlu0 %606 }
 0x477   : > { %v608_v19 = vrot.slane %v607_v38, 4 }
 0x479   : > { %v609_v24 = vadd.f32 %v608_v19, %v607_v38 }
 0x47a   : > { %v1646_v32 = vpop.xlane.xlu0 %1645 }
 0x47b   : > { %v610_v49 = vrot.slane %v609_v24, 2  ;;  %v1647_v28 = vrot.slane %v1646_v32, 4 }
 0x47d   : > { %v1648_v59 = vadd.f32 %v1647_v28, %v1646_v32  ;;  %v611_v10 = vadd.f32 %v610_v49, %v609_v24 }
 0x47f   : > { %v1649_v36 = vrot.slane %v1648_v59, 2  ;;  %v612_v45 = vrot.slane %v611_v10, 1 }
 0x481   : > { %v1650_v39 = vadd.f32 %v1649_v36, %v1648_v59  ;;  %v613_v57 = vadd.f32 %v612_v45, %v611_v10 }
 0x483   : > { %1823 = vpush %v613_v57  ;;  %v1651_v6 = vrot.slane %v1650_v39, 1 }
 0x485   : > { %v1652_v5 = vadd.f32 %v1651_v6, %v1650_v39 }
 0x487   : > { %1825 = vpush %v1652_v5 }
 0x4b4   : > { %s1824_s13 = spop %1823 }
 0x4b5   : > { %v1655_v37 = vstv %s1824_s13 }
 0x4b6   : > { %1656 = vst [vmem:[%s208_s10] sm:$0xff] %v1655_v37 }
 0x4b7   : > { %1950 = shalt.err (!%p1947_p4)
}
 0x4b8   : > { %s1951_s8 = scalar_lea.hbm %s2743_s22, 128  ;;  %s1955_s13 = scalar_lea.hbm %s2824_s3, 256 }
 0x4b9   : > { %p1952_p7 = scmp.ne.s32.totalorder %s2743_s22, %s1951_s8  ;;  %p1956_p10 = scmp.lt.u32.totalorder %s2743_s22, %s2824_s3 }
 0x4ba   : > { %p1957_p11 = scmp.lt.u32.totalorder %s1955_s13, %s1951_s8  ;;  %p1959_p13 = scmp.lt.u32.totalorder %s1951_s8, %s2743_s22 }
 0x4bb   : > { %p1953_p8 = pnand %p1952_p7, %p2101_p5 }
 0x4bc   : > { %p1958_p12 = por %p1957_p11, %p1956_p10 }
 0x4bd   : > { %p1954_p9 = pneg %p1953_p8 }
 0x4be   : > { %p1960_p0 = por %p1959_p13, %p1958_p12 }
 0x4c0   : > { %p1961_p1 = pnand %p1960_p0, %p1954_p9 }
 0x4c2   : > { %1964 = shalt.err (!%p1961_p1)
}
 0x4c3   : > { %1827 = dma.vmem_to_hbm [thread:$0]  (%p2101_p5), %s2736_s11, 128, %s2743_s22, %s1660_s28  }
 0x4c4   : > { %s1826_s29 = spop %1825  ;;  %s2775_s8 = scalar_lea.hbm %s2825_s4, %s1819_s12 }
 0x4c5   : > { %s1654_s30 = sadd.f32 4.8e-11, %s1826_s29  ;;  %s1665_s9 = scalar_lea.sflag [#allocation5], %s2732_s5 }
 0x4c6   : > { %s1965_s10 = scalar_lea.vmem %s2779_s27, 128  ;;  %s2037_s19 = smov [#allocation4]  }
 0x4c7   : > { %v1657_v52 = vstv %s1654_s30  ;;  %p1966_p2 = scmp.ne.s32.totalorder %s2779_s27, %s1965_s10  ;;  %s1969_s11 = sshll.u32 %s2037_s19, 4  ;;  %s1970_s11 = int_to_ptr.vmem [resolvable:$false] %s1969_s11 }
 0x4c8   : > { %1658 = vst [vmem:[%s2745_s23] sm:$0xff] %v1657_v52  ;;  %s1971_s22 = scalar_lea.vmem %s1970_s11, 256  ;;  %p1972_p7 = scmp.lt.s32.totalorder %s2779_s27, %s1970_s11 }
 0x4c9   : > { %p1967_p3 = pnand %p1966_p2, %p2101_p5  ;;  %p1973_p8 = scmp.lt.s32.totalorder %s1971_s22, %s1965_s10 }
 0x4cb   : > { %p1968_p4 = pneg %p1967_p3  ;;  %p1974_p9 = por %p1973_p8, %p1972_p7 }
 0x4cd   : > { %p1975_p10 = pnand %p1974_p9, %p1968_p4 }
 0x4cf   : > { %1978 = shalt.err (!%p1975_p10)
}
 0x4d0   : > { %s1979_s5 = scalar_lea.hbm %s2775_s8, 128  ;;  %s1983_s28 = scalar_lea.hbm %s2825_s4, 256 }
 0x4d1   : > { %p1980_p11 = scmp.ne.s32.totalorder %s2775_s8, %s1979_s5  ;;  %p1984_p0 = scmp.lt.u32.totalorder %s2775_s8, %s2825_s4 }
 0x4d2   : > { %p1985_p1 = scmp.lt.u32.totalorder %s1983_s28, %s1979_s5  ;;  %p1987_p3 = scmp.lt.u32.totalorder %s1979_s5, %s2775_s8 }
 0x4d3   : > { %p1981_p12 = pnand %p1980_p11, %p2101_p5 }
 0x4d4   : > { %p1986_p2 = por %p1985_p1, %p1984_p0 }
 0x4d5   : > { %p1982_p13 = pneg %p1981_p12 }
 0x4d6   : > { %p1988_p4 = por %p1987_p3, %p1986_p2 }
 0x4d8   : > { %p1989_p7 = pnand %p1988_p4, %p1982_p13 }
 0x4da   : > { %1992 = shalt.err (!%p1989_p7)
}
 0x4db   : > { %1828 = dma.vmem_to_hbm [thread:$0]  (%p2101_p5), %s2779_s27, 128, %s2775_s8, %s1665_s9  }
 0x4dc PF: > { %p1838_p8 = scmp.ge.s32.totalorder %s2031_s18, 2  ;;  %s1703_s20 = sand.u32 1, %s2019_s15  }
 0x4dd   : > { %s1704_s29 = scalar_lea.sflag [#allocation3], %s1703_s20 }
 0x4de   : > { %p1832_p9 = pnand %p1838_p8, %p2105_p6 }
 0x4e0   : > { %2010 = dma.done.wait (!%p1832_p9), %s1704_s29, 128  }
 0x4e1   : > { %2012 = vsyncadd (!%p1832_p9), %s1704_s29, 4294967168  ;;  %s1713_s30 = scalar_lea.sflag [#allocation5], %s1703_s20 }
 0x4e2   : > { %2014 = dma.done.wait (!%p1832_p9), %s1713_s30, 128  }
 0x4e3   : > { %2016 = vsyncadd (!%p1832_p9), %s1713_s30, 4294967168  ;;  %p18_p5 = scmp.ge.s32.totalorder %s2088_s21, 4   ;;  %s2828_s15 = smov %s2023_s16 }
 0x4e4   : > { %s2829_s16 = smov %s2027_s17  ;;  %s2830_s17 = smov %s2099_s24 }
 0x4e5   : > { %s2831_s18 = smov %s2088_s21  ;;  %20 = sbr.rel (!%p18_p5) target bundleno = 5 (0x5), region = 93 }
 0x4ec   :  { %1718 = vsyncpa [#allocation3], 1 }
 0x4ed   :  { %1720 = vsyncpa [#allocation3 + $0x1], 1 }
 0x4ee   :  { %1721 = vsyncpa [#allocation5], 1 }
 0x4ef   :  { %1723 = vsyncpa [#allocation5 + $0x1], 1 }

</bundles_post_ra>
